<compile_context>
chip_gen: v7x
topology: tpu7x:2x2x1
jax: 0.10.0
libtpu: 0.0.40
codegen_flags: <defaults>
</compile_context>

<pallas_src>
import functools

import jax
import jax.numpy as jnp
from jax.experimental import pallas as pl
from jax.experimental.pallas import tpu as pltpu


def _cnblock_kernel(x_ref, w_ref, b_ref, o_ref, *, ksize, pad):
    # x_ref: (1, H, W, Cin)        one batch element, unpadded, channels-last
    # w_ref: (KH*KW*Cin, Cout)     BN-scale-folded weights, rows in (kh, kw, cin) order
    # b_ref: (1, Cout)             folded BN bias = beta - mean * scale (f32)
    # o_ref: (1, Ho, Wo, Cout)
    H, W, Cin = x_ref.shape[1], x_ref.shape[2], x_ref.shape[3]
    Ho, Wo, Cout = o_ref.shape[1], o_ref.shape[2], o_ref.shape[3]
    KH = KW = ksize

    x = x_ref[0]                                              # (H, W, Cin)

    # Zero halo built in VMEM (no padded HBM copy in the wrapper).
    # Axis 0 (H) is a leading dim -> cheap concat; axis 1 (W) is the sublane axis.
    if pad > 0:
        zr = jnp.zeros((pad, W, Cin), x.dtype)
        x = jnp.concatenate([zr, x, zr], axis=0)              # (H+2p, W,    Cin)
        zc = jnp.zeros((H + 2 * pad, pad, Cin), x.dtype)
        x = jnp.concatenate([zc, x, zc], axis=1)              # (H+2p, W+2p, Cin)

    # KW sublane shifts: built once, reused across KH (leading-axis slices are free).
    x_kw = [x[:, kw:kw + Wo, :] for kw in range(KW)]          # each (H+2p, Wo, Cin)

    # im2col: concatenate taps along the lane axis -> single fat MXU matmul.
    cols = []
    for kh in range(KH):
        for kw in range(KW):
            cols.append(x_kw[kw][kh:kh + Ho].reshape(Ho * Wo, Cin))
    patches = jnp.concatenate(cols, axis=-1)                  # (Ho*Wo, KH*KW*Cin)

    acc = jnp.dot(patches, w_ref[...],                        # MXU, f32 accumulation
                  preferred_element_type=jnp.float32)         # (Ho*Wo, Cout)

    # BatchNorm (scale already folded into w) + ReLU, in f32.
    y = jnp.maximum(acc + b_ref[...], 0.0)
    o_ref[0] = y.reshape(Ho, Wo, Cout).astype(o_ref.dtype)


def cnblock_forward_nhwc(x_nhwc, w_oihw, gamma, beta, running_mean, running_var,
                         *, stride=1, padding=1, eps=1e-5,
                         compute_dtype=jnp.bfloat16):
    """Fused conv3x3(no bias) -> BN(eval) -> ReLU. NHWC in / NHWC out (f32)."""
    assert stride == 1, "CNBlock default stride=1"
    N, H, W, Cin = x_nhwc.shape
    Cout, Cin_w, KH, KW = w_oihw.shape
    assert Cin_w == Cin and KH == KW
    Ho = H + 2 * padding - KH + 1
    Wo = W + 2 * padding - KW + 1

    # Fold BN (running stats) into the conv: y = conv(x, w*scale) + bias.
    scale = gamma / jnp.sqrt(running_var + eps)
    bias = (beta - running_mean * scale).astype(jnp.float32).reshape(1, Cout)
    w = jnp.transpose(w_oihw, (2, 3, 1, 0)) * scale           # (KH, KW, Cin, Cout)
    w2d = w.reshape(KH * KW * Cin, Cout)                      # (kh, kw, cin) row order

    if compute_dtype is not None:                             # bf16 MXU inputs
        x_nhwc = x_nhwc.astype(compute_dtype)
        w2d = w2d.astype(compute_dtype)

    kernel = functools.partial(_cnblock_kernel, ksize=KH, pad=padding)

    # Note: for the demo Cout=8 the output store is lane-masked by construction;
    # production CNBlock channel counts (>=128) give lane-dense stores for free.
    out = pl.pallas_call(
        kernel,
        out_shape=jax.ShapeDtypeStruct((N, Ho, Wo, Cout), jnp.float32),
        grid_spec=pltpu.PrefetchScalarGridSpec(
            num_scalar_prefetch=0,
            grid=(N,),
            in_specs=[
                pl.BlockSpec((1, H, W, Cin), lambda n: (n, 0, 0, 0)),
                pl.BlockSpec((KH * KW * Cin, Cout), lambda n: (0, 0)),
                pl.BlockSpec((1, Cout), lambda n: (0, 0)),
            ],
            out_specs=pl.BlockSpec((1, Ho, Wo, Cout), lambda n: (n, 0, 0, 0)),
        ),
        compiler_params=pltpu.CompilerParams(
            dimension_semantics=("parallel",),
            vmem_limit_bytes=32 * 1024 * 1024,
        ),
    )(x_nhwc, w2d, bias)
    return out


def cnblock_forward(x_nchw, w_oihw, gamma, beta, running_mean, running_var,
                    *, stride=1, padding=1, eps=1e-5, compute_dtype=jnp.bfloat16):
    """NCHW adapter matching the PyTorch CNBlock interface.

    The two transposes are the only wrapper-side full-tensor passes left; use
    cnblock_forward_nhwc directly when the surrounding model is channels-last.
    """
    x_nhwc = jnp.transpose(x_nchw, (0, 2, 3, 1))
    out_nhwc = cnblock_forward_nhwc(
        x_nhwc, w_oihw, gamma, beta, running_mean, running_var,
        stride=stride, padding=padding, eps=eps, compute_dtype=compute_dtype)
    return jnp.transpose(out_nhwc, (0, 3, 1, 2))


def _reference(x_nchw, w_oihw, gamma, beta, running_mean, running_var, eps=1e-5):
    conv = jax.lax.conv_general_dilated(
        x_nchw, w_oihw, window_strides=(1, 1), padding=((1, 1), (1, 1)),
        dimension_numbers=("NCHW", "OIHW", "NCHW"))
    scale = (gamma / jnp.sqrt(running_var + eps)).reshape(1, -1, 1, 1)
    bias = (beta - running_mean * gamma / jnp.sqrt(running_var + eps)).reshape(1, -1, 1, 1)
    return jnp.maximum(conv * scale + bias, 0.0)


if __name__ == "__main__":
    # CNBlock(in_dim=4, out_dim=8, kernel_size=3, stride=1, padding=1,
    #         norm_cfg=SyncBN, ac_cfg=ReLU)
    N, Cin, H, W = 2, 4, 16, 16
    Cout, K = 8, 3

    key = jax.random.PRNGKey(0)
    kx, kw, kg, kb, km, kv = jax.random.split(key, 6)

    x = jax.random.normal(kx, (N, Cin, H, W), dtype=jnp.float32)
    w = jax.random.normal(kw, (Cout, Cin, K, K), dtype=jnp.float32) * 0.1
    gamma = 1.0 + 0.1 * jax.random.normal(kg, (Cout,), dtype=jnp.float32)
    beta = 0.1 * jax.random.normal(kb, (Cout,), dtype=jnp.float32)
    running_mean = 0.1 * jax.random.normal(km, (Cout,), dtype=jnp.float32)
    running_var = 1.0 + 0.1 * jax.random.uniform(kv, (Cout,), dtype=jnp.float32)

    ref = _reference(x, w, gamma, beta, running_mean, running_var)

    # f32 MXU-input path: strict check against the XLA conv reference.
    out_f32 = jax.block_until_ready(
        cnblock_forward(x, w, gamma, beta, running_mean, running_var,
                        compute_dtype=None))
    assert out_f32.shape == (N, Cout, H, W)
    assert jnp.allclose(out_f32, ref, atol=1e-3, rtol=1e-3), "f32 path mismatch"

    # Default bf16 MXU-input path (f32 accumulation / output): loose check.
    out_bf16 = jax.block_until_ready(
        cnblock_forward(x, w, gamma, beta, running_mean, running_var))
    assert out_bf16.shape == (N, Cout, H, W)
    assert jnp.allclose(out_bf16, ref, atol=2e-2, rtol=2e-2), "bf16 path mismatch"

    print("KERNEL_OK")
</pallas_src>

<mosaic_0001>
module attributes {stable_mosaic.version = 11 : i64} {
  func.func @_cnblock_kernel(%arg0: i32, %arg1: memref<1x16x16x4xf32, #tpu.memory_space<vmem>>, %arg2: memref<36x8xf32, #tpu.memory_space<vmem>>, %arg3: memref<1x8xf32, #tpu.memory_space<vmem>>, %arg4: memref<1x16x16x8xf32, #tpu.memory_space<vmem>>) attributes {dimension_semantics = [#tpu.dimension_semantics<parallel>], iteration_bounds = array<i64: 2>, scalar_prefetch = 0 : i64, scratch_operands = 0 : i64, tpu.core_type = #tpu.core_type<tc>, window_params = [{transform_indices = @transform_0, window_bounds = array<i64: 1, 16, 16, 4>}, {pipeline_mode = #tpu.pipeline_mode<synchronous>, transform_indices = @transform_1, window_bounds = array<i64: 36, 8>}, {pipeline_mode = #tpu.pipeline_mode<synchronous>, transform_indices = @transform_2, window_bounds = array<i64: 1, 8>}, {transform_indices = @transform_3, window_bounds = array<i64: 1, 16, 16, 8>}]} {
    %c0 = arith.constant 0 : index
    %c0_0 = arith.constant 0 : index
    %c0_1 = arith.constant 0 : index
    %c0_2 = arith.constant 0 : index
    %0 = vector.load %arg1[%c0, %c0_0, %c0_1, %c0_2] : memref<1x16x16x4xf32, #tpu.memory_space<vmem>>, vector<1x16x16x4xf32>
    %1 = vector.shape_cast %0 : vector<1x16x16x4xf32> to vector<16x16x4xf32>
    %cst = arith.constant 0.000000e+00 : f32
    %2 = vector.broadcast %cst : f32 to vector<1x16x4xf32>
    %3 = tpu.concatenate %2, %1, %2 in 0 : vector<1x16x4xf32>, vector<16x16x4xf32>, vector<1x16x4xf32> -> vector<18x16x4xf32>
    %cst_3 = arith.constant 0.000000e+00 : f32
    %4 = vector.broadcast %cst_3 : f32 to vector<18x1x4xf32>
    %5 = tpu.concatenate %4, %3, %4 in 1 : vector<18x1x4xf32>, vector<18x16x4xf32>, vector<18x1x4xf32> -> vector<18x18x4xf32>
    %6 = vector.extract_strided_slice %5 {offsets = [0, 0, 0], sizes = [18, 16, 4], strides = [1, 1, 1]} : vector<18x18x4xf32> to vector<18x16x4xf32>
    %7 = vector.extract_strided_slice %5 {offsets = [0, 1, 0], sizes = [18, 16, 4], strides = [1, 1, 1]} : vector<18x18x4xf32> to vector<18x16x4xf32>
    %8 = vector.extract_strided_slice %5 {offsets = [0, 2, 0], sizes = [18, 16, 4], strides = [1, 1, 1]} : vector<18x18x4xf32> to vector<18x16x4xf32>
    %9 = vector.extract_strided_slice %6 {offsets = [0, 0, 0], sizes = [16, 16, 4], strides = [1, 1, 1]} : vector<18x16x4xf32> to vector<16x16x4xf32>
    %10 = vector.shape_cast %9 : vector<16x16x4xf32> to vector<256x4xf32>
    %11 = vector.extract_strided_slice %7 {offsets = [0, 0, 0], sizes = [16, 16, 4], strides = [1, 1, 1]} : vector<18x16x4xf32> to vector<16x16x4xf32>
    %12 = vector.shape_cast %11 : vector<16x16x4xf32> to vector<256x4xf32>
    %13 = vector.extract_strided_slice %8 {offsets = [0, 0, 0], sizes = [16, 16, 4], strides = [1, 1, 1]} : vector<18x16x4xf32> to vector<16x16x4xf32>
    %14 = vector.shape_cast %13 : vector<16x16x4xf32> to vector<256x4xf32>
    %15 = vector.extract_strided_slice %6 {offsets = [1, 0, 0], sizes = [16, 16, 4], strides = [1, 1, 1]} : vector<18x16x4xf32> to vector<16x16x4xf32>
    %16 = vector.shape_cast %15 : vector<16x16x4xf32> to vector<256x4xf32>
    %17 = vector.extract_strided_slice %7 {offsets = [1, 0, 0], sizes = [16, 16, 4], strides = [1, 1, 1]} : vector<18x16x4xf32> to vector<16x16x4xf32>
    %18 = vector.shape_cast %17 : vector<16x16x4xf32> to vector<256x4xf32>
    %19 = vector.extract_strided_slice %8 {offsets = [1, 0, 0], sizes = [16, 16, 4], strides = [1, 1, 1]} : vector<18x16x4xf32> to vector<16x16x4xf32>
    %20 = vector.shape_cast %19 : vector<16x16x4xf32> to vector<256x4xf32>
    %21 = vector.extract_strided_slice %6 {offsets = [2, 0, 0], sizes = [16, 16, 4], strides = [1, 1, 1]} : vector<18x16x4xf32> to vector<16x16x4xf32>
    %22 = vector.shape_cast %21 : vector<16x16x4xf32> to vector<256x4xf32>
    %23 = vector.extract_strided_slice %7 {offsets = [2, 0, 0], sizes = [16, 16, 4], strides = [1, 1, 1]} : vector<18x16x4xf32> to vector<16x16x4xf32>
    %24 = vector.shape_cast %23 : vector<16x16x4xf32> to vector<256x4xf32>
    %25 = vector.extract_strided_slice %8 {offsets = [2, 0, 0], sizes = [16, 16, 4], strides = [1, 1, 1]} : vector<18x16x4xf32> to vector<16x16x4xf32>
    %26 = vector.shape_cast %25 : vector<16x16x4xf32> to vector<256x4xf32>
    %27 = tpu.concatenate %10, %12, %14, %16, %18, %20, %22, %24, %26 in 1 : vector<256x4xf32>, vector<256x4xf32>, vector<256x4xf32>, vector<256x4xf32>, vector<256x4xf32>, vector<256x4xf32>, vector<256x4xf32>, vector<256x4xf32>, vector<256x4xf32> -> vector<256x36xf32>
    %c0_4 = arith.constant 0 : index
    %c0_5 = arith.constant 0 : index
    %28 = vector.load %arg2[%c0_4, %c0_5] : memref<36x8xf32, #tpu.memory_space<vmem>>, vector<36x8xf32>
    %cst_6 = arith.constant dense<0.000000e+00> : vector<256x8xf32>
    %29 = tpu.matmul %27, %28, %cst_6 {dimension_numbers = #tpu.dot_dimension_numbers<[1], [0], [0], [1], [0, 0, 1, 1], [], []>} : vector<256x36xf32>, vector<36x8xf32>, vector<256x8xf32> -> vector<256x8xf32>
    %c0_7 = arith.constant 0 : index
    %c0_8 = arith.constant 0 : index
    %30 = vector.load %arg3[%c0_7, %c0_8] : memref<1x8xf32, #tpu.memory_space<vmem>>, vector<1x8xf32>
    %31 = vector.broadcast %30 : vector<1x8xf32> to vector<256x8xf32>
    %32 = arith.addf %29, %31 : vector<256x8xf32>
    %cst_9 = arith.constant 0.000000e+00 : f32
    %33 = vector.broadcast %cst_9 : f32 to vector<256x8xf32>
    %34 = arith.maximumf %32, %33 : vector<256x8xf32>
    %35 = vector.shape_cast %34 : vector<256x8xf32> to vector<16x16x8xf32>
    %c0_10 = arith.constant 0 : index
    %c0_11 = arith.constant 0 : index
    %c0_12 = arith.constant 0 : index
    %c0_13 = arith.constant 0 : index
    %36 = vector.load %arg4[%c0_10, %c0_11, %c0_12, %c0_13] : memref<1x16x16x8xf32, #tpu.memory_space<vmem>>, vector<1x16x16x8xf32>
    %37 = vector.shape_cast %36 : vector<1x16x16x8xf32> to vector<16x16x8xf32>
    %38 = vector.shape_cast %35 : vector<16x16x8xf32> to vector<1x16x16x8xf32>
    tpu.vector_store %arg4[%c0_10, %c0_11, %c0_12, %c0_13], %38 {strides = array<i32>} : memref<1x16x16x8xf32, #tpu.memory_space<vmem>>, vector<1x16x16x8xf32>,
    return
  }
  func.func @transform_0(%arg0: i32) -> (i32, i32, i32, i32) {
    %c0_i32 = arith.constant 0 : i32
    %c0_i32_0 = arith.constant 0 : i32
    %c0_i32_1 = arith.constant 0 : i32
    %c0_i32_2 = arith.constant 0 : i32
    return %arg0, %c0_i32, %c0_i32_0, %c0_i32_1 : i32, i32, i32, i32
  }
  func.func @transform_1(%arg0: i32) -> (i32, i32) {
    %c0_i32 = arith.constant 0 : i32
    %c0_i32_0 = arith.constant 0 : i32
    %c0_i32_1 = arith.constant 0 : i32
    return %c0_i32, %c0_i32_0 : i32, i32
  }
  func.func @transform_2(%arg0: i32) -> (i32, i32) {
    %c0_i32 = arith.constant 0 : i32
    %c0_i32_0 = arith.constant 0 : i32
    %c0_i32_1 = arith.constant 0 : i32
    return %c0_i32, %c0_i32_0 : i32, i32
  }
  func.func @transform_3(%arg0: i32) -> (i32, i32, i32, i32) {
    %c0_i32 = arith.constant 0 : i32
    %c0_i32_0 = arith.constant 0 : i32
    %c0_i32_1 = arith.constant 0 : i32
    %c0_i32_2 = arith.constant 0 : i32
    return %arg0, %c0_i32, %c0_i32_0, %c0_i32_1 : i32, i32, i32, i32
  }
}

</mosaic_0001>

<bundles_post_ra>
// kernel: tpu_custom_call.1
= control target key start
LH: loop header
LB: loop body
LE: loop exit
PB: predicated region body
PF: predicated region fallthrough
CT: control target
= control target key end

     0   :  { %s2300_s12 = smov 0   ;;  %s4101_s0 = inlined_call_operand.vmem [shape: f32[2,16,16,4], index: 0, kind: input, shape index: {}]   ;;  %s4102_s1 = inlined_call_operand.vmem [shape: f32[36,8], index: 1, kind: input, shape index: {}]   ;;  %s4103_s2 = inlined_call_operand.vmem [shape: f32[1,8], index: 2, kind: input, shape index: {}]   ;;  %s4104_s3 = inlined_call_operand.vmem [shape: f32[2,16,16,8], index: 3, kind: output, shape index: {}]  }
   0x1 LB: > { %s2065_s13 = sadd.s32 4294967295, %s2269_s12   ;;  %p2069_p0 = scmp.ge.s32.totalorder %s2269_s12, 1  ;;  %s2269_s12 = sphi %s2300_s12, %s13_s12  }
   0x2   : > { %p137_p1 = scmp.lt.s32.totalorder %s2269_s12, 3 }
   0x4   : > { %p138_p2 = pnand %p2069_p0, %p137_p1 }
   0x6   : > { %141 = sbr.rel (%p138_p2) target bundleno = 858 (0x35a), region = 32 }
   0xd   : > { %vm236_vm0 = vcmask 1040384   ;;  %p161_p3 = scmp.lt.s32.totalorder %s2065_s13, 1  ;;  %v2271_v0 = vmov 0.0   ;;  %vm402_vm1 = vcmask 1046528   ;;  %s2272_s18 = smov 4   ;;  %vm483_vm2 = vcmask 1045504  }
   0xe   : > { %v2308_v1 = vrot.slane %v2271_v0, 7  ;;  %s2273_s19 = smov 8   ;;  %s2274_s20 = smov 12   ;;  %vm1717_vm3 = vcmask 1043456   ;;  %vm1344_vm4 = vcmask 31744   ;;  %vm1377_vm5 = vcmask 64512  }
   0xf   : > { %s4445_s13 = smov (!%p161_p3, %s2065_s13), 1  ;;  %s2275_s21 = smov 16   ;;  %vm1410_vm6 = vcmask 97280   ;;  %vm1443_vm7 = vcmask 130048   ;;  %vm1476_vm8 = vcmask 162816   ;;  %vm1509_vm9 = vcmask 195584  }
  0x10   : > { %4230 = vst [vmem:[#allocation2_spill] sm:$0xff] %v2308_v1  ;;  %v2314_v2 = vsel %vm236_vm0, 0.0, %v2308_v1  ;;  %v2318_v3 = vsel %vm236_vm0, %v2308_v1, 0.0  ;;  %v404_v4 = vrot.slane %v2308_v1, 1  ;;  %s2110_s14 = sshll.u32 %s4445_s13, 8  ;;  %s2276_s22 = smov 20  }
  0x11   : > { %4231 = vst [vmem:[#allocation3_spill] sm:$0xff] %v2314_v2  ;;  %v403_v5 = vrot.slane %v2314_v2, 1  ;;  %v406_v6 = vrot.slane %v2318_v3, 1  ;;  %s2329_s17 = scalar_lea.vmem %s4101_s0, %s2110_s14  ;;  %s2277_s23 = smov 24   ;;  %vm1542_vm10 = vcmask 228352   ;;  %vm1575_vm11 = vcmask 261120  }
  0x12   : > { %v171_v9 = vld [vmem:[%s2329_s17] sm:$0xff]  ;;  %v172_v10 = vld [vmem:[%s2329_s17 + $0x8] sm:$0xff]  ;;  %v173_v11 = vld [vmem:[%s2329_s17 + $0x10] sm:$0xff]  ;;  %s2278_s28 = smov 28   ;;  %s2279_s8 = smov 32   ;;  %vm1620_vm12 = vcmask 293888  }
  0x13   : > { %v405_v7 = vsel %vm402_vm1, %v403_v5, %v404_v4  ;;  %v407_v8 = vsel %vm402_vm1, %v404_v4, %v406_v6  ;;  %v239_v13 = vrot.slane %v171_v9, 7  ;;  %v240_v14 = vrot.slane %v172_v10, 7  ;;  %v174_v15 = vld [vmem:[%s2329_s17 + $0x18] sm:$0xff]  ;;  %v175_v16 = vld [vmem:[%s2329_s17 + $0x20] sm:$0xff]  ;;  %v176_v17 = vld [vmem:[%s2329_s17 + $0x28] sm:$0xff]  ;;  %s3941_s16 = scalar_lea.vmem %s4104_s3, %s2110_s14 }
  0x14   : > { %v2336_v12 = vpack.i.bf16 %v407_v8, %v405_v7  ;;  %v242_v18 = vrot.slane %v173_v11, 7  ;;  %v243_v19 = vrot.slane %v174_v15, 7  ;;  %v245_v20 = vrot.slane %v175_v16, 7  ;;  %v177_v22 = vld [vmem:[%s2329_s17 + $0x30] sm:$0xff]  ;;  %v178_v31 = vld [vmem:[%s2329_s17 + $0x38] sm:$0xff]  ;;  %v179_v40 = vld [vmem:[%s2329_s17 + $0x40] sm:$0xff] }
  0x15   : > { %v246_v21 = vrot.slane %v176_v17, 7  ;;  %v2345_v23 = vsel %vm236_vm0, %v239_v13, %v240_v14  ;;  %v2348_v24 = vsel %vm236_vm0, %v240_v14, 0.0  ;;  %v2351_v25 = vsel %vm236_vm0, 0.0, %v239_v13  ;;  %v180_v49 = vld [vmem:[%s2329_s17 + $0x48] sm:$0xff]  ;;  %v181_v50 = vld [vmem:[%s2329_s17 + $0x50] sm:$0xff]  ;;  %v182_v55 = vld [vmem:[%s2329_s17 + $0x58] sm:$0xff] }
  0x16   : > { %4232 = vst [vmem:[#allocation4_spill] sm:$0xff] %v2336_v12  ;;  %2239 = vrot.lane.b32.xlu0 %v2336_v12, %s2272_s18  ;;  %4233 = vst [vmem:[#allocation5_spill] sm:$0xff] %v2345_v23  ;;  %v248_v26 = vrot.slane %v177_v22, 7  ;;  %v409_v27 = vrot.slane %v2345_v23, 1  ;;  %v411_v28 = vrot.slane %v2348_v24, 1  ;;  %v408_v29 = vrot.slane %v2351_v25, 1 }
  0x17   : > { %4234 = vst [vmem:[#allocation6_spill] sm:$0xff] %v2351_v25  ;;  %v2357_v30 = vsel %vm236_vm0, %v242_v18, %v243_v19  ;;  %v2361_v32 = vsel %vm236_vm0, 0.0, %v242_v18  ;;  %v2365_v34 = vsel %vm236_vm0, %v243_v19, 0.0  ;;  %v2368_v35 = vsel %vm236_vm0, %v245_v20, %v246_v21  ;;  %v183_v4 = vld [vmem:[%s2329_s17 + $0x60] sm:$0xff]  ;;  %v184_v5 = vld [vmem:[%s2329_s17 + $0x68] sm:$0xff]  ;;  %v185_v19 = vld [vmem:[%s2329_s17 + $0x70] sm:$0xff] }
  0x18   : > { %v414_v33 = vrot.slane %v2357_v30, 1  ;;  %v2371_v36 = vsel %vm402_vm1, %v409_v27, %v411_v28  ;;  %v2374_v37 = vsel %vm402_vm1, %v408_v29, %v409_v27  ;;  %v413_v38 = vrot.slane %v2361_v32, 1  ;;  %v193_v12 = vld [vmem:[%s2329_s17 + $0xb0] sm:$0xff] }
  0x19   : > { %v416_v39 = vrot.slane %v2365_v34, 1  ;;  %582 = vrot.lane.b32.xlu1 %v2371_v36, %s2272_s18  ;;  %v2384_v41 = vsel %vm236_vm0, 0.0, %v245_v20  ;;  %v419_v42 = vrot.slane %v2368_v35, 1  ;;  %v2388_v43 = vsel %vm236_vm0, %v246_v21, 0.0  ;;  %v186_v20 = vld [vmem:[%s2329_s17 + $0x78] sm:$0xff] }
  0x1a   : > { %580 = vrot.lane.b32.xlu0 %v2374_v37, %s2272_s18  ;;  %v249_v44 = vrot.slane %v178_v31, 7  ;;  %v2391_v45 = vsel %vm402_vm1, %v413_v38, %v414_v33  ;;  %v418_v47 = vrot.slane %v2384_v41, 1  ;;  %v421_v48 = vrot.slane %v2388_v43, 1 }
  0x1b   : > { %v2394_v46 = vsel %vm402_vm1, %v414_v33, %v416_v39  ;;  %v2404_v52 = vsel %vm236_vm0, 0.0, %v248_v26  ;;  %v251_v54 = vrot.slane %v179_v40, 7  ;;  %v252_v58 = vrot.slane %v180_v49, 7  ;;  %v187_v39 = vld [vmem:[%s2329_s17 + $0x80] sm:$0xff]  ;;  %v188_v40 = vld [vmem:[%s2329_s17 + $0x88] sm:$0xff] }
  0x1c   : > { %v2401_v51 = vsel %vm236_vm0, %v248_v26, %v249_v44  ;;  %v2407_v53 = vsel %vm236_vm0, %v249_v44, 0.0  ;;  %v2411_v56 = vsel %vm402_vm1, %v418_v47, %v419_v42  ;;  %v2418_v57 = vsel %vm402_vm1, %v419_v42, %v421_v48 }
  0x1d   : > { %584 = vrot.lane.b32.xlu1 %v2391_v45, %s2272_s18  ;;  %v2421_v59 = vsel %vm236_vm0, 0.0, %v251_v54  ;;  %v254_v60 = vrot.slane %v181_v50, 7  ;;  %v423_v61 = vrot.slane %v2404_v52, 1  ;;  %v424_v62 = vrot.slane %v2401_v51, 1 }
  0x1e   : > { %586 = vrot.lane.b32.xlu0 %v2394_v46, %s2272_s18  ;;  %v426_v63 = vrot.slane %v2407_v53, 1  ;;  %v255_v0 = vrot.slane %v182_v55, 7  ;;  %v2429_v6 = vsel %vm236_vm0, %v251_v54, %v252_v58  ;;  %v2432_v7 = vsel %vm236_vm0, %v252_v58, 0.0  ;;  %v189_v54 = vld [vmem:[%s2329_s17 + $0x90] sm:$0xff] }
  0x1f   : > { %v428_v8 = vrot.slane %v2421_v59, 1  ;;  %v429_v9 = vrot.slane %v2429_v6, 1  ;;  %v2441_v10 = vsel %vm236_vm0, 0.0, %v254_v60  ;;  %v257_v11 = vrot.slane %v183_v4, 7 }
  0x20   : > { %v258_v13 = vrot.slane %v184_v5, 7  ;;  %v2444_v14 = vsel %vm402_vm1, %v423_v61, %v424_v62  ;;  %v2447_v15 = vsel %vm402_vm1, %v424_v62, %v426_v63  ;;  %v431_v16 = vrot.slane %v2432_v7, 1  ;;  %v190_v63 = vld [vmem:[%s2329_s17 + $0x98] sm:$0xff] }
  0x21   : > { %588 = vrot.lane.b32.xlu1 %v2411_v56, %s2272_s18  ;;  %4235 = vst [vmem:[#allocation7_spill] sm:$0xff] %v2444_v14  ;;  %4236 = vst [vmem:[#allocation8_spill] sm:$0xff] %v2447_v15  ;;  %v2451_v17 = vsel %vm236_vm0, %v254_v60, %v255_v0  ;;  %v2454_v18 = vsel %vm236_vm0, %v255_v0, 0.0  ;;  %v433_v21 = vrot.slane %v2441_v10, 1  ;;  %v2464_v22 = vsel %vm402_vm1, %v428_v8, %v429_v9 }
  0x22   : > { %590 = vrot.lane.b32.xlu0 %v2418_v57, %s2272_s18  ;;  %4237 = vst [vmem:[#allocation9_spill] sm:$0xff] %v2464_v22  ;;  %v434_v26 = vrot.slane %v2451_v17, 1  ;;  %v2468_v27 = vsel %vm236_vm0, %v257_v11, %v258_v13  ;;  %v2471_v28 = vsel %vm236_vm0, 0.0, %v257_v11  ;;  %v2474_v29 = vsel %vm402_vm1, %v429_v9, %v431_v16 }
  0x23   : > { %4238 = vst [vmem:[#allocation10_spill] sm:$0xff] %v2474_v29  ;;  %v436_v31 = vrot.slane %v2454_v18, 1  ;;  %v260_v33 = vrot.slane %v185_v19, 7  ;;  %v261_v38 = vrot.slane %v186_v20, 7  ;;  %v2480_v42 = vsel %vm236_vm0, %v258_v13, 0.0 }
  0x24   : > { %v438_v44 = vrot.slane %v2471_v28, 1  ;;  %v439_v47 = vrot.slane %v2468_v27, 1  ;;  %v2489_v48 = vsel %vm402_vm1, %v433_v21, %v434_v26  ;;  %v263_v49 = vrot.slane %v187_v39, 7  ;;  %v191_v21 = vld [vmem:[%s2329_s17 + $0xa0] sm:$0xff] }
  0x25   : > { %592 = vrot.lane.b32.xlu1 %v2444_v14, %s2272_s18  ;;  %4239 = vst [vmem:[#allocation11_spill] sm:$0xff] %v2489_v48  ;;  %v264_v50 = vrot.slane %v188_v40, 7  ;;  %v2493_v55 = vsel %vm402_vm1, %v434_v26, %v436_v31  ;;  %v441_v58 = vrot.slane %v2480_v42, 1  ;;  %v2497_v60 = vsel %vm236_vm0, %v260_v33, %v261_v38  ;;  %v192_v26 = vld [vmem:[%s2329_s17 + $0xa8] sm:$0xff] }
  0x26   : > { %594 = vrot.lane.b32.xlu0 %v2447_v15, %s2272_s18  ;;  %4240 = vst [vmem:[#allocation12_spill] sm:$0xff] %v2493_v55  ;;  %4241 = vst [vmem:[#allocation13_spill] sm:$0xff] %v2497_v60  ;;  %v2500_v61 = vsel %vm236_vm0, 0.0, %v260_v33  ;;  %v2503_v62 = vsel %vm236_vm0, %v261_v38, 0.0  ;;  %v2507_v0 = vsel %vm402_vm1, %v438_v44, %v439_v47  ;;  %v266_v4 = vrot.slane %v189_v54, 7  ;;  %v199_v15 = vld [vmem:[%s2329_s17 + $0xe0] sm:$0xff] }
  0x27   : > { %4242 = vst [vmem:[#allocation14_spill] sm:$0xff] %v2500_v61  ;;  %4243 = vst [vmem:[#allocation15_spill] sm:$0xff] %v2507_v0  ;;  %v443_v5 = vrot.slane %v2500_v61, 1  ;;  %v444_v8 = vrot.slane %v2497_v60, 1  ;;  %v2516_v9 = vsel %vm236_vm0, %v263_v49, %v264_v50  ;;  %v2519_v11 = vsel %vm236_vm0, 0.0, %v263_v49 }
  0x28   : > { %4244 = vst [vmem:[#allocation16_spill] sm:$0xff] %v2516_v9  ;;  %4245 = vst [vmem:[#allocation17_spill] sm:$0xff] %v2519_v11  ;;  %v2522_v13 = vsel %vm402_vm1, %v439_v47, %v441_v58  ;;  %v446_v16 = vrot.slane %v2503_v62, 1  ;;  %v2526_v19 = vsel %vm236_vm0, %v264_v50, 0.0  ;;  %v267_v20 = vrot.slane %v190_v63, 7 }
  0x29   : > { %596 = vrot.lane.b32.xlu1 %v2464_v22, %s2272_s18  ;;  %4246 = vst [vmem:[#allocation18_spill] sm:$0xff] %v2522_v13  ;;  %v485_v31 = vrot.slane %v2308_v1, 2  ;;  %v487_v33 = vrot.slane %v2318_v3, 2  ;;  %v448_v38 = vrot.slane %v2519_v11, 1  ;;  %v449_v39 = vrot.slane %v2516_v9, 1  ;;  %v197_v1 = vld [vmem:[%s2329_s17 + $0xd0] sm:$0xff] }
  0x2a   : > { %598 = vrot.lane.b32.xlu0 %v2474_v29, %s2272_s18  ;;  %v484_v40 = vrot.slane %v2314_v2, 2  ;;  %v2540_v44 = vsel %vm402_vm1, %v443_v5, %v444_v8  ;;  %v451_v47 = vrot.slane %v2526_v19, 1  ;;  %v2544_v49 = vsel %vm236_vm0, 0.0, %v266_v4  ;;  %v194_v5 = vld [vmem:[%s2329_s17 + $0xb8] sm:$0xff] }
  0x2b   : > { %4247 = vst [vmem:[#allocation19_spill] sm:$0xff] %v2540_v44  ;;  %v269_v3 = vrot.slane %v191_v21, 7  ;;  %v2547_v50 = vsel %vm402_vm1, %v444_v8, %v446_v16  ;;  %v2550_v54 = vsel %vm236_vm0, %v266_v4, %v267_v20  ;;  %v2553_v58 = vsel %vm236_vm0, %v267_v20, 0.0 }
  0x2c   : > { %4248 = vst [vmem:[#allocation20_spill] sm:$0xff] %v2547_v50  ;;  %v270_v63 = vrot.slane %v192_v26, 7  ;;  %v486_v21 = vsel %vm483_vm2, %v484_v40, %v485_v31  ;;  %v488_v8 = vsel %vm483_vm2, %v485_v31, %v487_v33  ;;  %v2568_v4 = vsel %vm402_vm1, %v449_v39, %v451_v47 }
  0x2d   : > { %600 = vrot.lane.b32.xlu1 %v2489_v48, %s2272_s18  ;;  %4250 = vst [vmem:[#allocation22_spill] sm:$0xff] %v2568_v4  ;;  %v454_v16 = vrot.slane %v2550_v54, 1  ;;  %v456_v20 = vrot.slane %v2553_v58, 1  ;;  %v2573_v26 = vsel %vm236_vm0, 0.0, %v269_v3  ;;  %v272_v33 = vrot.slane %v193_v12, 7 }
  0x2e   : > { %602 = vrot.lane.b32.xlu0 %v2493_v55, %s2272_s18  ;;  %v2579_v31 = vsel %vm236_vm0, %v270_v63, 0.0  ;;  %v273_v40 = vrot.slane %v194_v5, 7  ;;  %v458_v47 = vrot.slane %v2573_v26, 1  ;;  %v278_v2 = vrot.slane %v197_v1, 7 }
  0x2f   : > { %v2594_v12 = vsel %vm402_vm1, %v454_v16, %v456_v20  ;;  %v461_v5 = vrot.slane %v2579_v31, 1 }
  0x30   : > { %4253 = vst [vmem:[#allocation25_spill] sm:$0xff] %v2594_v12  ;;  %v2605_v55 = vsel %vm236_vm0, %v273_v40, 0.0 }
  0x31   : > { %604 = vrot.lane.b32.xlu1 %v2507_v0, %s2272_s18  ;;  %v453_v0 = vrot.slane %v2544_v49, 1 }
  0x32   : > { %606 = vrot.lane.b32.xlu0 %v2522_v13, %s2272_s18  ;;  %v2558_v13 = vsel %vm402_vm1, %v448_v38, %v449_v39  ;;  %v2576_v38 = vsel %vm236_vm0, %v269_v3, %v270_v63  ;;  %v2582_v39 = vpack.i.bf16 %v488_v8, %v486_v21  ;;  %v2599_v21 = vsel %vm236_vm0, %v272_v33, %v273_v40 }
  0x33   : > { %4249 = vst [vmem:[#allocation21_spill] sm:$0xff] %v2558_v13  ;;  %v2591_v3 = vsel %vm402_vm1, %v453_v0, %v454_v16  ;;  %v459_v63 = vrot.slane %v2576_v38, 1  ;;  %4254 = vst [vmem:[#allocation26_spill] sm:$0xff] %v2599_v21  ;;  %v2602_v8 = vsel %vm236_vm0, 0.0, %v272_v33  ;;  %v198_v16 = vld [vmem:[%s2329_s17 + $0xd8] sm:$0xff]  ;;  %v464_v29 = vrot.slane %v2599_v21, 1 }
  0x34   : > { %4251 = vst [vmem:[#allocation23_spill] sm:$0xff] %v2582_v39  ;;  %4252 = vst [vmem:[#allocation24_spill] sm:$0xff] %v2591_v3  ;;  %v463_v33 = vrot.slane %v2602_v8, 1  ;;  %v466_v40 = vrot.slane %v2605_v55, 1  ;;  %v279_v22 = vrot.slane %v198_v16, 7 }
  0x35   : > { %608 = vrot.lane.b32.xlu1 %v2540_v44, %s2272_s18  ;;  %v196_v44 = vld [vmem:[%s2329_s17 + $0xc8] sm:$0xff]  ;;  %4255 = vst [vmem:[#allocation27_spill] sm:$0xff] %v2602_v8  ;;  %v2614_v20 = vsel %vm402_vm1, %v458_v47, %v459_v63 }
  0x36   : > { %610 = vrot.lane.b32.xlu0 %v2547_v50, %s2272_s18  ;;  %v195_v50 = vld [vmem:[%s2329_s17 + $0xc0] sm:$0xff]  ;;  %v276_v0 = vrot.slane %v196_v44, 7  ;;  %4256 = vst [vmem:[#allocation28_spill] sm:$0xff] %v2614_v20  ;;  %v2620_v44 = vsel %vm402_vm1, %v459_v63, %v461_v5  ;;  %v2638_v63 = vsel %vm402_vm1, %v463_v33, %v464_v29  ;;  %v2641_v1 = vsel %vm402_vm1, %v464_v29, %v466_v40 }
  0x37   : > { %v275_v48 = vrot.slane %v195_v50, 7  ;;  %4257 = vst [vmem:[#allocation29_spill] sm:$0xff] %v2620_v44  ;;  %4260 = vst [vmem:[#allocation32_spill] sm:$0xff] %v2638_v63 }
  0x38   : > { %v2630_v47 = vsel %vm236_vm0, %v276_v0, 0.0  ;;  %4261 = vst [vmem:[#allocation33_spill] sm:$0xff] %v2641_v1 }
  0x39   : > { %612 = vrot.lane.b32.xlu1 %v2558_v13, %s2272_s18  ;;  %v2623_v50 = vsel %vm236_vm0, 0.0, %v275_v48  ;;  %v2627_v14 = vsel %vm236_vm0, %v275_v48, %v276_v0  ;;  %v281_v48 = vrot.slane %v199_v15, 7  ;;  %v471_v0 = vrot.slane %v2630_v47, 1 }
  0x3a   : > { %614 = vrot.lane.b32.xlu0 %v2568_v4, %s2272_s18  ;;  %4258 = vst [vmem:[#allocation30_spill] sm:$0xff] %v2623_v50  ;;  %4259 = vst [vmem:[#allocation31_spill] sm:$0xff] %v2627_v14  ;;  %v468_v5 = vrot.slane %v2623_v50, 1  ;;  %v469_v16 = vrot.slane %v2627_v14, 1 }
  0x3c   : > { %v2662_v40 = vsel %vm402_vm1, %v468_v5, %v469_v16 }
  0x3d   : > { %616 = vrot.lane.b32.xlu1 %v2591_v3, %s2272_s18  ;;  %v2647_v3 = vsel %vm236_vm0, %v278_v2, %v279_v22  ;;  %4264 = vst [vmem:[#allocation36_spill] sm:$0xff] %v2662_v40 }
  0x3e   : > { %618 = vrot.lane.b32.xlu0 %v2594_v12, %s2272_s18  ;;  %v200_v12 = vld [vmem:[%s2329_s17 + $0xe8] sm:$0xff]  ;;  %4262 = vst [vmem:[#allocation34_spill] sm:$0xff] %v2647_v3  ;;  %v474_v29 = vrot.slane %v2647_v3, 1 }
  0x3f   : > { %v282_v33 = vrot.slane %v200_v12, 7  ;;  %v2669_v12 = vsel %vm236_vm0, 0.0, %v281_v48 }
  0x40   : > { %4266 = vst [vmem:[#allocation38_spill] sm:$0xff] %v2669_v12  ;;  %v478_v5 = vrot.slane %v2669_v12, 1 }
  0x41   : > { %620 = vrot.lane.b32.xlu1 %v2614_v20, %s2272_s18  ;;  %v2650_v20 = vsel %vm236_vm0, 0.0, %v278_v2  ;;  %v2665_v2 = vsel %vm402_vm1, %v469_v16, %v471_v0 }
  0x42   : > { %622 = vrot.lane.b32.xlu0 %v2620_v44, %s2272_s18  ;;  %4263 = vst [vmem:[#allocation35_spill] sm:$0xff] %v2650_v20  ;;  %v2653_v44 = vsel %vm236_vm0, %v279_v22, 0.0  ;;  %v473_v15 = vrot.slane %v2650_v20, 1  ;;  %4265 = vst [vmem:[#allocation37_spill] sm:$0xff] %v2665_v2 }
  0x43   : > { %v476_v22 = vrot.slane %v2653_v44, 1 }
  0x44   : > { %v2683_v16 = vsel %vm402_vm1, %v473_v15, %v474_v29  ;;  %v489_v15 = vrot.slane %v2351_v25, 2 }
  0x45   : > { %624 = vrot.lane.b32.xlu1 %v2638_v63, %s2272_s18  ;;  %v2672_v63 = vsel %vm236_vm0, %v281_v48, %v282_v33  ;;  %4268 = vst [vmem:[#allocation40_spill] sm:$0xff] %v2683_v16  ;;  %v2686_v0 = vsel %vm402_vm1, %v474_v29, %v476_v22  ;;  %v490_v29 = vrot.slane %v2345_v23, 2 }
  0x46   : > { %626 = vrot.lane.b32.xlu0 %v2641_v1, %s2272_s18  ;;  %4267 = vst [vmem:[#allocation39_spill] sm:$0xff] %v2672_v63  ;;  %v2675_v1 = vsel %vm236_vm0, %v282_v33, 0.0  ;;  %4269 = vst [vmem:[#allocation41_spill] sm:$0xff] %v2686_v0  ;;  %v479_v48 = vrot.slane %v2672_v63, 1 }
  0x47   : > { %v481_v4 = vrot.slane %v2675_v1, 1  ;;  %v2707_v22 = vsel %vm483_vm2, %v489_v15, %v490_v29 }
  0x48   : > { %v2695_v33 = vsel %vm402_vm1, %v478_v5, %v479_v48  ;;  %v494_v5 = vrot.slane %v2361_v32, 2 }
  0x49   : > { %628 = vrot.lane.b32.xlu1 %v2662_v40, %s2272_s18  ;;  %4270 = vst [vmem:[#allocation42_spill] sm:$0xff] %v2695_v33  ;;  %v512_v40 = vrot.slane %v2432_v7, 2 }
  0x4a   : > { %630 = vrot.lane.b32.xlu0 %v2665_v2, %s2272_s18  ;;  %v2698_v2 = vsel %vm402_vm1, %v479_v48, %v481_v4  ;;  %v495_v4 = vrot.slane %v2357_v30, 2  ;;  %v497_v48 = vrot.slane %v2365_v34, 2 }
  0x4b   : > { %4271 = vst [vmem:[#allocation43_spill] sm:$0xff] %v2698_v2 }
  0x4c   : > { %v2721_v15 = vsel %vm483_vm2, %v494_v5, %v495_v4  ;;  %v505_v5 = vrot.slane %v2401_v51, 2 }
  0x4d   : > { %632 = vrot.lane.b32.xlu1 %v2683_v16, %s2272_s18  ;;  %v507_v16 = vrot.slane %v2407_v53, 2 }
  0x4e   : > { %634 = vrot.lane.b32.xlu0 %v2686_v0, %s2272_s18  ;;  %v492_v0 = vrot.slane %v2348_v24, 2  ;;  %v499_v24 = vrot.slane %v2384_v41, 2 }
  0x4f   : > { %v2757_v53 = vsel %vm483_vm2, %v505_v5, %v507_v16 }
  0x50   : > { %4273 = vst [vmem:[#allocation45_spill] sm:$0xff] %v2757_v53 }
  0x51   : > { %636 = vrot.lane.b32.xlu1 %v2695_v33, %s2272_s18  ;;  %v500_v33 = vrot.slane %v2368_v35, 2 }
  0x52   : > { %638 = vrot.lane.b32.xlu0 %v2698_v2, %s2272_s18  ;;  %v2718_v2 = vsel %vm483_vm2, %v490_v29, %v492_v0  ;;  %v502_v0 = vrot.slane %v2388_v43, 2  ;;  %v504_v29 = vrot.slane %v2404_v52, 2  ;;  %v509_v43 = vrot.slane %v2421_v59, 2 }
  0x53   : > { %v2733_v34 = vsel %vm483_vm2, %v499_v24, %v500_v33  ;;  %v510_v24 = vrot.slane %v2429_v6, 2 }
  0x55   : > { %2244 = vrot.lane.b32.xlu1 %v2582_v39, %s2273_s19  ;;  %v2730_v39 = vsel %vm483_vm2, %v495_v4, %v497_v48  ;;  %v2744_v4 = vsel %vm483_vm2, %v500_v33, %v502_v0  ;;  %v2747_v48 = vsel %vm483_vm2, %v504_v29, %v505_v5  ;;  %v2760_v33 = vsel %vm483_vm2, %v509_v43, %v510_v24 }
  0x56   : > { %676 = vrot.lane.b32.xlu0 %v2707_v22, %s2273_s19  ;;  %4272 = vst [vmem:[#allocation44_spill] sm:$0xff] %v2747_v48  ;;  %4274 = vst [vmem:[#allocation46_spill] sm:$0xff] %v2760_v33  ;;  %v514_v0 = vrot.slane %v2441_v10, 2  ;;  %v515_v29 = vrot.slane %v2451_v17, 2  ;;  %v2770_v7 = vsel %vm483_vm2, %v510_v24, %v512_v40  ;;  %v519_v5 = vrot.slane %v2471_v28, 2 }
  0x57   : > { %4275 = vst [vmem:[#allocation47_spill] sm:$0xff] %v2770_v7  ;;  %v520_v43 = vrot.slane %v2468_v27, 2  ;;  %v522_v40 = vrot.slane %v2480_v42, 2  ;;  %v524_v24 = vrot.slane %v2500_v61, 2  ;;  %v529_v42 = vrot.slane %v2519_v11, 2 }
  0x58   : > { %v2773_v16 = vsel %vm483_vm2, %v514_v0, %v515_v29  ;;  %v525_v0 = vrot.slane %v2497_v60, 2 }
  0x59   : > { %678 = vrot.lane.b32.xlu1 %v2718_v2, %s2273_s19  ;;  %4276 = vst [vmem:[#allocation48_spill] sm:$0xff] %v2773_v16 }
  0x5a   : > { %680 = vrot.lane.b32.xlu0 %v2721_v15, %s2273_s19 }
  0x5d   : > { %682 = vrot.lane.b32.xlu1 %v2730_v39, %s2273_s19 }
  0x5e   : > { %684 = vrot.lane.b32.xlu0 %v2733_v34, %s2273_s19 }
  0x61   : > { %686 = vrot.lane.b32.xlu1 %v2744_v4, %s2273_s19 }
  0x62   : > { %688 = vrot.lane.b32.xlu0 %v2747_v48, %s2273_s19  ;;  %v517_v48 = vrot.slane %v2454_v18, 2  ;;  %v2785_v18 = vsel %vm483_vm2, %v519_v5, %v520_v43  ;;  %v530_v5 = vrot.slane %v2516_v9, 2 }
  0x63   : > { %4278 = vst [vmem:[#allocation50_spill] sm:$0xff] %v2785_v18 }
  0x65   : > { %690 = vrot.lane.b32.xlu1 %v2757_v53, %s2273_s19 }
  0x66   : > { %692 = vrot.lane.b32.xlu0 %v2760_v33, %s2273_s19  ;;  %v2782_v33 = vsel %vm483_vm2, %v515_v29, %v517_v48  ;;  %v2796_v48 = vsel %vm483_vm2, %v520_v43, %v522_v40  ;;  %v2799_v29 = vsel %vm483_vm2, %v524_v24, %v525_v0  ;;  %v2812_v43 = vsel %vm483_vm2, %v529_v42, %v530_v5 }
  0x67   : > { %4277 = vst [vmem:[#allocation49_spill] sm:$0xff] %v2782_v33  ;;  %4279 = vst [vmem:[#allocation51_spill] sm:$0xff] %v2796_v48  ;;  %v534_v40 = vrot.slane %v2544_v49, 2  ;;  %v535_v24 = vrot.slane %v2550_v54, 2  ;;  %v540_v42 = vrot.slane %v2576_v38, 2 }
  0x68   : > { %4280 = vst [vmem:[#allocation52_spill] sm:$0xff] %v2799_v29  ;;  %4282 = vst [vmem:[#allocation54_spill] sm:$0xff] %v2812_v43 }
  0x69   : > { %694 = vrot.lane.b32.xlu1 %v2770_v7, %s2273_s19  ;;  %v557_v7 = vrot.slane %v2653_v44, 2 }
  0x6a   : > { %696 = vrot.lane.b32.xlu0 %v2773_v16, %s2273_s19  ;;  %v527_v16 = vrot.slane %v2503_v62, 2 }
  0x6c   : > { %v2809_v62 = vsel %vm483_vm2, %v525_v0, %v527_v16  ;;  %v2825_v16 = vsel %vm483_vm2, %v534_v40, %v535_v24  ;;  %v539_v0 = vrot.slane %v2573_v26, 2  ;;  %v545_v40 = vrot.slane %v2599_v21, 2 }
  0x6d   : > { %698 = vrot.lane.b32.xlu1 %v2782_v33, %s2273_s19  ;;  %4281 = vst [vmem:[#allocation53_spill] sm:$0xff] %v2809_v62  ;;  %v552_v33 = vrot.slane %v2630_v47, 2 }
  0x6e   : > { %700 = vrot.lane.b32.xlu0 %v2785_v18, %s2273_s19  ;;  %v532_v18 = vrot.slane %v2526_v19, 2 }
  0x70   : > { %v2822_v19 = vsel %vm483_vm2, %v530_v5, %v532_v18  ;;  %v542_v18 = vrot.slane %v2579_v31, 2  ;;  %v544_v5 = vrot.slane %v2602_v8, 2  ;;  %v549_v31 = vrot.slane %v2623_v50, 2 }
  0x71   : > { %702 = vrot.lane.b32.xlu1 %v2796_v48, %s2273_s19  ;;  %4283 = vst [vmem:[#allocation55_spill] sm:$0xff] %v2822_v19  ;;  %v547_v48 = vrot.slane %v2605_v55, 2 }
  0x72   : > { %704 = vrot.lane.b32.xlu0 %v2799_v29, %s2273_s19  ;;  %v537_v29 = vrot.slane %v2553_v58, 2  ;;  %v2837_v58 = vsel %vm483_vm2, %v539_v0, %v540_v42  ;;  %v550_v0 = vrot.slane %v2627_v14, 2 }
  0x73   : > { %v2861_v55 = vsel %vm483_vm2, %v545_v40, %v547_v48 }
  0x74   : > { %4285 = vst [vmem:[#allocation57_spill] sm:$0xff] %v2861_v55  ;;  %v2874_v47 = vsel %vm483_vm2, %v550_v0, %v552_v33 }
  0x75   : > { %706 = vrot.lane.b32.xlu1 %v2809_v62, %s2273_s19  ;;  %v2834_v62 = vsel %vm483_vm2, %v535_v24, %v537_v29  ;;  %v2848_v29 = vsel %vm483_vm2, %v540_v42, %v542_v18  ;;  %v2851_v24 = vsel %vm483_vm2, %v544_v5, %v545_v40  ;;  %v2864_v42 = vsel %vm483_vm2, %v549_v31, %v550_v0 }
  0x76   : > { %708 = vrot.lane.b32.xlu0 %v2812_v43, %s2273_s19  ;;  %4284 = vst [vmem:[#allocation56_spill] sm:$0xff] %v2851_v24  ;;  %4286 = vst [vmem:[#allocation58_spill] sm:$0xff] %v2864_v42  ;;  %v554_v18 = vrot.slane %v2650_v20, 2  ;;  %v555_v5 = vrot.slane %v2647_v3, 2  ;;  %v559_v40 = vrot.slane %v2669_v12, 2  ;;  %v560_v31 = vrot.slane %v2672_v63, 2 }
  0x77   : > { %4287 = vst [vmem:[#allocation59_spill] sm:$0xff] %v2874_v47  ;;  %v562_v0 = vrot.slane %v2675_v1, 2 }
  0x78   : > { %v2877_v48 = vsel %vm483_vm2, %v554_v18, %v555_v5  ;;  %v2888_v44 = vsel %vm483_vm2, %v555_v5, %v557_v7  ;;  %v2891_v33 = vsel %vm483_vm2, %v559_v40, %v560_v31 }
  0x79   : > { %710 = vrot.lane.b32.xlu1 %v2822_v19, %s2273_s19  ;;  %4288 = vst [vmem:[#allocation60_spill] sm:$0xff] %v2877_v48  ;;  %4290 = vst [vmem:[#allocation62_spill] sm:$0xff] %v2888_v44 }
  0x7a   : > { %712 = vrot.lane.b32.xlu0 %v2825_v16, %s2273_s19  ;;  %4291 = vst [vmem:[#allocation63_spill] sm:$0xff] %v2891_v33 }
  0x7d   : > { %714 = vrot.lane.b32.xlu1 %v2834_v62, %s2273_s19 }
  0x7e   : > { %716 = vrot.lane.b32.xlu0 %v2837_v58, %s2273_s19 }
  0x81   : > { %718 = vrot.lane.b32.xlu1 %v2848_v29, %s2273_s19 }
  0x82   : > { %720 = vrot.lane.b32.xlu0 %v2851_v24, %s2273_s19 }
  0x85   : > { %722 = vrot.lane.b32.xlu1 %v2861_v55, %s2273_s19 }
  0x86   : > { %724 = vrot.lane.b32.xlu0 %v2864_v42, %s2273_s19 }
  0x88   : > { %v2881_v53 = vpop.permute.xlu0 %2239 }
  0x89   : > { %4289 = vst [vmem:[#allocation61_spill] sm:$0xff] %v2881_v53  ;;  %726 = vrot.lane.b32.xlu1 %v2874_v47, %s2273_s19 }
  0x8a   : > { %728 = vrot.lane.b32.xlu0 %v2877_v48, %s2273_s19  ;;  %v2903_v48 = vsel %vm483_vm2, %v560_v31, %v562_v0 }
  0x8b   : > { %v2894_v18 = vpop.permute.xlu1 %582  ;;  %4294 = vst [vmem:[#allocation66_spill] sm:$0xff] %v2903_v48 }
  0x8c   : > { %4292 = vst [vmem:[#allocation64_spill] sm:$0xff] %v2894_v18  ;;  %v2896_v42 = vpop.permute.xlu0 %580 }
  0x8d   : > { %4293 = vst [vmem:[#allocation65_spill] sm:$0xff] %v2896_v42  ;;  %730 = vrot.lane.b32.xlu1 %v2888_v44, %s2273_s19 }
  0x8e   : > { %732 = vrot.lane.b32.xlu0 %v2891_v33, %s2273_s19 }
  0x8f   : > { %v2905_v7 = vpop.permute.xlu1 %584 }
  0x90   : > { %v2907_v5 = vpop.permute.xlu0 %586 }
  0x91   : > { %734 = vrot.lane.b32.xlu1 %v2903_v48, %s2273_s19 }
  0x92   : > { %768 = vrot.lane.b32.xlu0 %v2351_v25, %s2274_s20 }
  0x93   : > { %v2913_v1 = vpop.permute.xlu1 %588 }
  0x94   : > { %v2915_v40 = vpop.permute.xlu0 %590 }
  0x95   : > { %770 = vrot.lane.b32.xlu1 %v2345_v23, %s2274_s20 }
  0x96   : > { %772 = vrot.lane.b32.xlu0 %v2361_v32, %s2274_s20 }
  0x97   : > { %v2921_v31 = vpop.permute.xlu1 %592 }
  0x98   : > { %v2923_v0 = vpop.permute.xlu0 %594 }
  0x99   : > { %774 = vrot.lane.b32.xlu1 %v2357_v30, %s2274_s20 }
  0x9a   : > { %776 = vrot.lane.b32.xlu0 %v2384_v41, %s2274_s20 }
  0x9b   : > { %v2929_v48 = vpop.permute.xlu1 %596 }
  0x9c   : > { %v2931_v33 = vpop.permute.xlu0 %598 }
  0x9d   : > { %778 = vrot.lane.b32.xlu1 %v2368_v35, %s2274_s20 }
  0x9e   : > { %780 = vrot.lane.b32.xlu0 %v2404_v52, %s2274_s20 }
  0x9f   : > { %v2937_v44 = vpop.permute.xlu1 %600 }
  0xa0   : > { %v2939_v23 = vpop.permute.xlu0 %602 }
  0xa1   : > { %782 = vrot.lane.b32.xlu1 %v2401_v51, %s2274_s20 }
  0xa2   : > { %784 = vrot.lane.b32.xlu0 %v2421_v59, %s2274_s20 }
  0xa3   : > { %v2945_v18 = vpop.permute.xlu1 %604 }
  0xa4   : > { %v2947_v25 = vpop.permute.xlu0 %606 }
  0xa5   : > { %786 = vrot.lane.b32.xlu1 %v2429_v6, %s2274_s20 }
  0xa6   : > { %788 = vrot.lane.b32.xlu0 %v2441_v10, %s2274_s20 }
  0xa7   : > { %v2953_v42 = vpop.permute.xlu1 %608 }
  0xa8   : > { %4295 = vst [vmem:[#allocation67_spill] sm:$0xff] %v2953_v42  ;;  %v2955_v47 = vpop.permute.xlu0 %610 }
  0xa9   : > { %4296 = vst [vmem:[#allocation68_spill] sm:$0xff] %v2955_v47  ;;  %790 = vrot.lane.b32.xlu1 %v2451_v17, %s2274_s20 }
  0xaa   : > { %792 = vrot.lane.b32.xlu0 %v2471_v28, %s2274_s20 }
  0xab   : > { %v2961_v53 = vpop.permute.xlu1 %612 }
  0xac   : > { %4297 = vst [vmem:[#allocation69_spill] sm:$0xff] %v2961_v53  ;;  %v2963_v55 = vpop.permute.xlu0 %614 }
  0xad   : > { %4298 = vst [vmem:[#allocation70_spill] sm:$0xff] %v2963_v55  ;;  %794 = vrot.lane.b32.xlu1 %v2468_v27, %s2274_s20 }
  0xae   : > { %796 = vrot.lane.b32.xlu0 %v2500_v61, %s2274_s20 }
  0xaf   : > { %v2969_v24 = vpop.permute.xlu1 %616 }
  0xb0   : > { %v2971_v42 = vpop.permute.xlu0 %618 }
  0xb1   : > { %798 = vrot.lane.b32.xlu1 %v2497_v60, %s2274_s20 }
  0xb2   : > { %800 = vrot.lane.b32.xlu0 %v2519_v11, %s2274_s20 }
  0xb3   : > { %v2977_v47 = vpop.permute.xlu1 %620 }
  0xb4   : > { %v2979_v53 = vpop.permute.xlu0 %622 }
  0xb5   : > { %4299 = vst [vmem:[#allocation71_spill] sm:$0xff] %v2979_v53  ;;  %802 = vrot.lane.b32.xlu1 %v2516_v9, %s2274_s20 }
  0xb6   : > { %804 = vrot.lane.b32.xlu0 %v2544_v49, %s2274_s20 }
  0xb7   : > { %v2985_v55 = vpop.permute.xlu1 %624 }
  0xb8   : > { %4300 = vst [vmem:[#allocation72_spill] sm:$0xff] %v2985_v55  ;;  %v2987_v61 = vpop.permute.xlu0 %626 }
  0xb9   : > { %4301 = vst [vmem:[#allocation73_spill] sm:$0xff] %v2987_v61  ;;  %806 = vrot.lane.b32.xlu1 %v2550_v54, %s2274_s20 }
  0xba   : > { %808 = vrot.lane.b32.xlu0 %v2573_v26, %s2274_s20 }
  0xbb   : > { %v2993_v11 = vpop.permute.xlu1 %628 }
  0xbc   : > { %4302 = vst [vmem:[#allocation74_spill] sm:$0xff] %v2993_v11  ;;  %v2995_v60 = vpop.permute.xlu0 %630 }
  0xbd   : > { %4303 = vst [vmem:[#allocation75_spill] sm:$0xff] %v2995_v60  ;;  %810 = vrot.lane.b32.xlu1 %v2576_v38, %s2274_s20  ;;  %v201_v60 = vld [vmem:[%s2329_s17 + $0xf0] sm:$0xff] }
  0xbe   : > { %812 = vrot.lane.b32.xlu0 %v2602_v8, %s2274_s20 }
  0xbf   : > { %v3001_v9 = vpop.permute.xlu1 %632 }
  0xc0   : > { %4304 = vst [vmem:[#allocation76_spill] sm:$0xff] %v3001_v9  ;;  %v3003_v61 = vpop.permute.xlu0 %634  ;;  %v284_v9 = vrot.slane %v201_v60, 7 }
  0xc1   : > { %4305 = vst [vmem:[#allocation77_spill] sm:$0xff] %v3003_v61  ;;  %814 = vrot.lane.b32.xlu1 %v2599_v21, %s2274_s20  ;;  %v3023_v21 = vld [vmem:[%s2329_s17 + $0xf8] sm:$0xff] }
  0xc2   : > { %816 = vrot.lane.b32.xlu0 %v2623_v50, %s2274_s20  ;;  %4310 = vst [vmem:[#allocation82_spill] sm:$0xff] %v3023_v21 }
  0xc3   : > { %v3009_v11 = vpop.permute.xlu1 %636 }
  0xc4   : > { %4306 = vst [vmem:[#allocation78_spill] sm:$0xff] %v3009_v11  ;;  %v3011_v55 = vpop.permute.xlu0 %638  ;;  %v4215_v11 = vrot.slane %v3023_v21, 7 }
  0xc5   : > { %4307 = vst [vmem:[#allocation79_spill] sm:$0xff] %v3011_v55  ;;  %818 = vrot.lane.b32.xlu1 %v2627_v14, %s2274_s20  ;;  %v3030_v55 = vsel %vm236_vm0, 0.0, %v284_v9 }
  0xc6   : > { %820 = vrot.lane.b32.xlu0 %v2650_v20, %s2274_s20  ;;  %4311 = vst [vmem:[#allocation83_spill] sm:$0xff] %v3030_v55 }
  0xc7   : > { %v3018_v8 = vpop.permute.xlu1 %2244 }
  0xc8   : > { %4308 = vst [vmem:[#allocation80_spill] sm:$0xff] %v3018_v8  ;;  %v3020_v61 = vpop.permute.xlu0 %676 }
  0xc9   : > { %4309 = vst [vmem:[#allocation81_spill] sm:$0xff] %v3020_v61  ;;  %822 = vrot.lane.b32.xlu1 %v2647_v3, %s2274_s20  ;;  %v3044_v61 = vsel %vm236_vm0, %v284_v9, %v4215_v11 }
  0xca   : > { %824 = vrot.lane.b32.xlu0 %v2669_v12, %s2274_s20  ;;  %4313 = vst [vmem:[#allocation85_spill] sm:$0xff] %v3044_v61 }
  0xcb   : > { %v3033_v14 = vpop.permute.xlu1 %678 }
  0xcc   : > { %4312 = vst [vmem:[#allocation84_spill] sm:$0xff] %v3033_v14  ;;  %v3035_v60 = vpop.permute.xlu0 %680 }
  0xcd   : > { %826 = vrot.lane.b32.xlu1 %v2672_v63, %s2274_s20 }
  0xce   : > { %828 = vrot.lane.b32.xlu0 %v3030_v55, %s2274_s20  ;;  %v4314_v55 = vld [vmem:[#allocation22_spill] sm:$0xff] }
  0xcf   : > { %v3046_v8 = vpop.permute.xlu1 %682 }
  0xd0   : > { %v3048_v12 = vpop.permute.xlu0 %684 }
  0xd1   : > { %830 = vrot.lane.b32.xlu1 %v3044_v61, %s2274_s20 }
  0xd2   : > { %864 = vrot.lane.b32.xlu0 %v2374_v37, %s2275_s21 }
  0xd3   : > { %v3054_v14 = vpop.permute.xlu1 %686 }
  0xd4   : > { %v3056_v63 = vpop.permute.xlu0 %688 }
  0xd5   : > { %866 = vrot.lane.b32.xlu1 %v2371_v36, %s2275_s21 }
  0xd6   : > { %868 = vrot.lane.b32.xlu0 %v2391_v45, %s2275_s21 }
  0xd7   : > { %v3062_v9 = vpop.permute.xlu1 %690 }
  0xd8   : > { %v3064_v11 = vpop.permute.xlu0 %692 }
  0xd9   : > { %870 = vrot.lane.b32.xlu1 %v2394_v46, %s2275_s21 }
  0xda   : > { %872 = vrot.lane.b32.xlu0 %v2411_v56, %s2275_s21 }
  0xdb   : > { %v3070_v37 = vpop.permute.xlu1 %694 }
  0xdc   : > { %v3072_v21 = vpop.permute.xlu0 %696 }
  0xdd   : > { %874 = vrot.lane.b32.xlu1 %v2418_v57, %s2275_s21 }
  0xde   : > { %896 = vrot.lane.b32.xlu0 %v2558_v13, %s2275_s21 }
  0xdf   : > { %v3078_v36 = vpop.permute.xlu1 %698 }
  0xe0   : > { %v3080_v61 = vpop.permute.xlu0 %700 }
  0xe1   : > { %898 = vrot.lane.b32.xlu1 %v4314_v55, %s2275_s21 }
  0xe2   : > { %960 = vrot.lane.b32.xlu0 %v2707_v22, %s2276_s22 }
  0xe3   : > { %v3086_v3 = vpop.permute.xlu1 %702 }
  0xe4   : > { %v3088_v20 = vpop.permute.xlu0 %704 }
  0xe5   : > { %4315 = vst [vmem:[#allocation86_spill] sm:$0xff] %v3088_v20  ;;  %992 = vrot.lane.b32.xlu1 %v2812_v43, %s2276_s22  ;;  %v1608_v43 = vld [vmem:[%s4102_s1] sm:$0xff] }
  0xe6   : > { %962 = vrot.lane.b32.xlu0 %v2718_v2, %s2276_s22  ;;  %v1609_v2 = vld [vmem:[%s4102_s1 + $0x8] sm:$0xff] }
  0xe7   : > { %v3094_v13 = vpop.permute.xlu1 %706 }
  0xe8   : > { %4316 = vst [vmem:[#allocation87_spill] sm:$0xff] %v3094_v13  ;;  %v3096_v50 = vpop.permute.xlu0 %708  ;;  %v1610_v13 = vld [vmem:[%s4102_s1 + $0x10] sm:$0xff] }
  0xe9   : > { %4317 = vst [vmem:[#allocation88_spill] sm:$0xff] %v3096_v50  ;;  %994 = vrot.lane.b32.xlu1 %v2822_v19, %s2276_s22  ;;  %v2207_v19 = vpack.c.bf16 %v1609_v2, %v1608_v43  ;;  %v1611_v43 = vld [vmem:[%s4102_s1 + $0x18] sm:$0xff] }
  0xea   : > { %1056 = vrot.lane.b32.xlu0 %v2361_v32, %s2277_s23  ;;  %v2211_v2 = vpack.c.bf16 %v1611_v43, %v1610_v13 }
  0xeb   : > { %v3102_v22 = vpop.permute.xlu1 %710  ;;  %2208 = vmatprep.subr.bf16.mxu0 %v2207_v19  ;;  %2215 = vmatprep.subr.bf16.mxu1 %v2207_v19 }
  0xec   : > { %4318 = vst [vmem:[#allocation89_spill] sm:$0xff] %v3102_v22  ;;  %v3104_v55 = vpop.permute.xlu0 %712  ;;  %2210 = vmatpush3.bf16.msra.mxu0 %v2207_v19  ;;  %2218 = vmatpush3.bf16.msra.mxu1 %v2207_v19  ;;  %v4321_v19 = vld [vmem:[#allocation24_spill] sm:$0xff] }
  0xed   : > { %1088 = vrot.lane.b32.xlu1 %v2544_v49, %s2277_s23  ;;  %2212 = vmatprep.subr.bf16.mxu0 %v2211_v2 }
  0xee   : > { %1058 = vrot.lane.b32.xlu0 %v2357_v30, %s2277_s23  ;;  %2216 = vmatprep.subr.bf16.mxu1 %v2211_v2 }
  0xef   : > { %v3116_v50 = vpop.permute.xlu1 %714 }
  0xf0   : > { %v3118_v22 = vpop.permute.xlu0 %716  ;;  %2214 = vmatpush3.bf16.msra.mxu0 %v2211_v2  ;;  %2219 = vmatpush3.bf16.msra.mxu1 %v2211_v2 }
  0xf1   : > { %1090 = vrot.lane.b32.xlu1 %v2550_v54, %s2277_s23 }
  0xf2   : > { %1152 = vrot.lane.b32.xlu0 %v2391_v45, %s2278_s28  ;;  %v1612_v45 = vld [vmem:[%s4102_s1 + $0x20] sm:$0xf] }
  0xf3   : > { %v3130_v20 = vpop.permute.xlu1 %718  ;;  %2157 = vmatprep.subr.msk.mxu0 %vm1717_vm3, %v1612_v45  ;;  %2217 = vmatprep.subr.msk.mxu1 %vm1717_vm3, %v1612_v45 }
  0xf4   : > { %4319 = vst [vmem:[#allocation90_spill] sm:$0xff] %v3130_v20  ;;  %v3132_v53 = vpop.permute.xlu0 %720  ;;  %2158 = vmatpush3.msk.msra.mxu0 %vm1717_vm3, %v1612_v45  ;;  %2220 = vmatpush3.msk.msra.mxu1 %vm1717_vm3, %v1612_v45 }
  0xf5   : > { %4320 = vst [vmem:[#allocation91_spill] sm:$0xff] %v3132_v53  ;;  %1184 = vrot.lane.b32.xlu1 %v4321_v19, %s2278_s28  ;;  %v4323_v53 = vld [vmem:[#allocation25_spill] sm:$0xff] }
  0xf6   : > { %900 = vrot.lane.b32.xlu0 %v4321_v19, %s2275_s21 }
  0xf7   : > { %v3141_v13 = vpop.permute.xlu1 %722 }
  0xf8   : > { %v3143_v43 = vpop.permute.xlu0 %724 }
  0xf9   : > { %4322 = vst [vmem:[#allocation24_spill] sm:$0xff] %v3143_v43  ;;  %1154 = vrot.lane.b32.xlu1 %v2394_v46, %s2278_s28 }
  0xfa   : > { %1186 = vrot.lane.b32.xlu0 %v4323_v53, %s2278_s28 }
  0xfb   : > { %v3149_v19 = vpop.permute.xlu1 %726 }
  0xfc   : > { %v3151_v20 = vpop.permute.xlu0 %728 }
  0xfd   : > { %4324 = vst [vmem:[#allocation25_spill] sm:$0xff] %v3151_v20  ;;  %1248 = vrot.lane.b32.xlu1 %v2721_v15, %s2279_s8 }
  0xfe   : > { %1280 = vrot.lane.b32.xlu0 %v2825_v16, %s2279_s8 }
  0xff   : > { %v3157_v2 = vpop.permute.xlu1 %730 }
 0x100   : > { %4325 = vst [vmem:[#allocation92_spill] sm:$0xff] %v3157_v2  ;;  %v3159_v43 = vpop.permute.xlu0 %732 }
 0x101   : > { %902 = vrot.lane.b32.xlu1 %v4323_v53, %s2275_s21 }
 0x102   : > { %964 = vrot.lane.b32.xlu0 %v2721_v15, %s2276_s22  ;;  %v1349_v15 = vsel %vm1344_vm4, %v2361_v32, %v2905_v7  ;;  %v1350_v32 = vsel %vm1344_vm4, %v2357_v30, %v2907_v5  ;;  %v1352_v30 = vsel %vm1344_vm4, %v2368_v35, %v2915_v40 }
 0x103   : > { %v3165_v46 = vpop.permute.xlu1 %734  ;;  %v1382_v53 = vsel %vm1377_vm5, %v1349_v15, %v3035_v60  ;;  %v1383_v7 = vsel %vm1377_vm5, %v1350_v32, %v3046_v8  ;;  %v1385_v8 = vsel %vm1377_vm5, %v1352_v30, %v3054_v14  ;;  %v1355_v14 = vsel %vm1344_vm4, %v2421_v59, %v2929_v48 }
 0x104   : > { %v3167_v45 = vpop.permute.xlu0 %768  ;;  %v1388_v40 = vsel %vm1377_vm5, %v1355_v14, %v3064_v11  ;;  %v1356_v48 = vsel %vm1344_vm4, %v2429_v6, %v2931_v33  ;;  %v1357_v11 = vsel %vm1344_vm4, %v2441_v10, %v2937_v44  ;;  %v4331_v33 = vld [vmem:[#allocation29_spill] sm:$0xff]  ;;  %v1358_v44 = vsel %vm1344_vm4, %v2451_v17, %v2939_v23 }
 0x105   : > { %996 = vrot.lane.b32.xlu1 %v2825_v16, %s2276_s22  ;;  %v1360_v23 = vsel %vm1344_vm4, %v2468_v27, %v2947_v25  ;;  %v1365_v25 = vsel %vm1344_vm4, %v2544_v49, %v2969_v24  ;;  %v1367_v49 = vsel %vm1344_vm4, %v2573_v26, %v2977_v47 }
 0x106   : > { %1250 = vrot.lane.b32.xlu0 %v2730_v39, %s2279_s8 }
 0x107   : > { %v3173_v20 = vpop.permute.xlu1 %770 }
 0x108   : > { %4326 = vst [vmem:[#allocation93_spill] sm:$0xff] %v3173_v20  ;;  %v3175_v2 = vpop.permute.xlu0 %772 }
 0x109   : > { %4327 = vst [vmem:[#allocation94_spill] sm:$0xff] %v3175_v2  ;;  %1282 = vrot.lane.b32.xlu1 %v2834_v62, %s2279_s8 }
 0x10a   : > { %966 = vrot.lane.b32.xlu0 %v2730_v39, %s2276_s22  ;;  %v1351_v39 = vsel %vm1344_vm4, %v2384_v41, %v2913_v1 }
 0x10b   : > { %v3186_v16 = vpop.permute.xlu1 %774 }
 0x10c   : > { %v777_v20 = vpop.permute.xlu0 %776 }
 0x10d   : > { %v3189_v2 = vsel %vm1410_vm6, %v1382_v53, %v777_v20  ;;  %998 = vrot.lane.b32.xlu1 %v2834_v62, %s2276_s22  ;;  %v1384_v20 = vsel %vm1377_vm5, %v1351_v39, %v3048_v12 }
 0x10e   : > { %1060 = vrot.lane.b32.xlu0 %v2384_v41, %s2277_s23  ;;  %v1353_v41 = vsel %vm1344_vm4, %v2404_v52, %v2921_v31 }
 0x10f   : > { %v779_v60 = vpop.permute.xlu1 %778  ;;  %v1386_v12 = vsel %vm1377_vm5, %v1353_v41, %v3056_v63 }
 0x110   : > { %v781_v15 = vpop.permute.xlu0 %780  ;;  %v3206_v62 = vsel %vm1410_vm6, %v1383_v7, %v779_v60  ;;  %v1390_v60 = vsel %vm1377_vm5, %v1357_v11, %v3072_v21  ;;  %v1359_v21 = vsel %vm1344_vm4, %v2471_v28, %v2945_v18 }
 0x111   : > { %v3209_v53 = vsel %vm1410_vm6, %v1384_v20, %v781_v15  ;;  %1092 = vrot.lane.b32.xlu1 %v2573_v26, %s2277_s23 }
 0x112   : > { %1062 = vrot.lane.b32.xlu0 %v2368_v35, %s2277_s23  ;;  %v1354_v35 = vsel %vm1344_vm4, %v2401_v51, %v2923_v0  ;;  %v4328_v0 = vld [vmem:[#allocation28_spill] sm:$0xff] }
 0x113   : > { %v783_v5 = vpop.permute.xlu1 %782  ;;  %v1387_v63 = vsel %vm1377_vm5, %v1354_v35, %v3062_v9  ;;  %v1389_v9 = vsel %vm1377_vm5, %v1356_v48, %v3070_v37  ;;  %v1391_v37 = vsel %vm1377_vm5, %v1358_v44, %v3078_v36  ;;  %v4341_v44 = vld [vmem:[#allocation26_spill] sm:$0xff] }
 0x114   : > { %v785_v1 = vpop.permute.xlu0 %784  ;;  %v3226_v32 = vsel %vm1410_vm6, %v1385_v8, %v783_v5 }
 0x115   : > { %v3229_v39 = vsel %vm1410_vm6, %v1386_v12, %v785_v1  ;;  %1094 = vrot.lane.b32.xlu1 %v2576_v38, %s2277_s23  ;;  %v1392_v12 = vsel %vm1377_vm5, %v1359_v21, %v3080_v61  ;;  %v1393_v61 = vsel %vm1377_vm5, %v1360_v23, %v3086_v3  ;;  %v1398_v3 = vsel %vm1377_vm5, %v1365_v25, %v3104_v55  ;;  %v4344_v23 = vld [vmem:[#allocation24_spill] sm:$0xff] }
 0x116   : > { %1156 = vrot.lane.b32.xlu0 %v2411_v56, %s2278_s28  ;;  %v1400_v55 = vsel %vm1377_vm5, %v1367_v49, %v3118_v22  ;;  %v4338_v22 = vld [vmem:[#allocation90_spill] sm:$0xff]  ;;  %v4348_v49 = vld [vmem:[#allocation31_spill] sm:$0xff] }
 0x117   : > { %v787_v31 = vpop.permute.xlu1 %786 }
 0x118   : > { %v789_v7 = vpop.permute.xlu0 %788  ;;  %v3246_v20 = vsel %vm1410_vm6, %v1387_v63, %v787_v31 }
 0x119   : > { %v3249_v56 = vsel %vm1410_vm6, %v1388_v40, %v789_v7  ;;  %1188 = vrot.lane.b32.xlu1 %v4328_v0, %s2278_s28 }
 0x11a   : > { %904 = vrot.lane.b32.xlu0 %v4328_v0, %s2275_s21 }
 0x11b   : > { %v791_v15 = vpop.permute.xlu1 %790 }
 0x11c   : > { %v793_v30 = vpop.permute.xlu0 %792  ;;  %v3266_v41 = vsel %vm1410_vm6, %v1389_v9, %v791_v15 }
 0x11d   : > { %4329 = vst [vmem:[#allocation28_spill] sm:$0xff] %v3266_v41  ;;  %v3269_v8 = vsel %vm1410_vm6, %v1390_v60, %v793_v30  ;;  %1158 = vrot.lane.b32.xlu1 %v2418_v57, %s2278_s28  ;;  %v4339_v60 = vld [vmem:[#allocation91_spill] sm:$0xff] }
 0x11e   : > { %4330 = vst [vmem:[#allocation95_spill] sm:$0xff] %v3269_v8  ;;  %1190 = vrot.lane.b32.xlu0 %v4331_v33, %s2278_s28 }
 0x11f   : > { %v795_v5 = vpop.permute.xlu1 %794 }
 0x120   : > { %v797_v1 = vpop.permute.xlu0 %796  ;;  %v3286_v57 = vsel %vm1410_vm6, %v1391_v37, %v795_v5  ;;  %v4342_v37 = vld [vmem:[#allocation74_spill] sm:$0xff] }
 0x121   : > { %4332 = vst [vmem:[#allocation29_spill] sm:$0xff] %v3286_v57  ;;  %v3289_v35 = vsel %vm1410_vm6, %v1392_v12, %v797_v1  ;;  %1252 = vrot.lane.b32.xlu1 %v2733_v34, %s2279_s8  ;;  %v4343_v12 = vld [vmem:[#allocation30_spill] sm:$0xff] }
 0x122   : > { %4333 = vst [vmem:[#allocation96_spill] sm:$0xff] %v3289_v35  ;;  %1284 = vrot.lane.b32.xlu0 %v2837_v58, %s2279_s8  ;;  %v1371_v5 = vsel %vm1344_vm4, %v4343_v12, %v4342_v37 }
 0x123   : > { %v799_v18 = vpop.permute.xlu1 %798 }
 0x124   : > { %v3300_v36 = vpop.permute.xlu0 %800  ;;  %v3303_v14 = vsel %vm1410_vm6, %v1393_v61, %v799_v18  ;;  %v1404_v61 = vsel %vm1377_vm5, %v1371_v5, %v4344_v23 }
 0x125   : > { %4334 = vst [vmem:[#allocation97_spill] sm:$0xff] %v3303_v14  ;;  %906 = vrot.lane.b32.xlu1 %v4331_v33, %s2275_s21 }
 0x126   : > { %968 = vrot.lane.b32.xlu0 %v2733_v34, %s2276_s22 }
 0x127   : > { %v3309_v63 = vpop.permute.xlu1 %802 }
 0x128   : > { %v3311_v40 = vpop.permute.xlu0 %804 }
 0x129   : > { %1000 = vrot.lane.b32.xlu1 %v2837_v58, %s2276_s22  ;;  %v1366_v58 = vsel %vm1344_vm4, %v2550_v54, %v2971_v42  ;;  %v4335_v54 = vld [vmem:[#allocation71_spill] sm:$0xff] }
 0x12a   : > { %1254 = vrot.lane.b32.xlu0 %v2744_v4, %s2279_s8  ;;  %v1399_v24 = vsel %vm1377_vm5, %v1366_v58, %v3116_v50  ;;  %v1368_v26 = vsel %vm1344_vm4, %v2576_v38, %v4335_v54  ;;  %v4336_v50 = vld [vmem:[#allocation72_spill] sm:$0xff]  ;;  %v4337_v42 = vld [vmem:[#allocation27_spill] sm:$0xff]  ;;  %v4340_v38 = vld [vmem:[#allocation73_spill] sm:$0xff] }
 0x12b   : > { %v3322_v31 = vpop.permute.xlu1 %806  ;;  %v1369_v47 = vsel %vm1344_vm4, %v4337_v42, %v4336_v50  ;;  %v1401_v9 = vsel %vm1377_vm5, %v1368_v26, %v4338_v22  ;;  %v1370_v21 = vsel %vm1344_vm4, %v4341_v44, %v4340_v38  ;;  %v4347_v58 = vld [vmem:[#allocation75_spill] sm:$0xff]  ;;  %v4351_v54 = vld [vmem:[#allocation25_spill] sm:$0xff] }
 0x12c   : > { %v809_v34 = vpop.permute.xlu0 %808  ;;  %v1402_v15 = vsel %vm1377_vm5, %v1369_v47, %v4339_v60  ;;  %v1403_v1 = vsel %vm1377_vm5, %v1370_v21, %v3141_v13  ;;  %v1372_v13 = vsel %vm1344_vm4, %v4348_v49, %v4347_v58  ;;  %v4355_v60 = vld [vmem:[#allocation77_spill] sm:$0xff] }
 0x12d   : > { %v3325_v7 = vsel %vm1410_vm6, %v1398_v3, %v809_v34  ;;  %1286 = vrot.lane.b32.xlu1 %v2848_v29, %s2279_s8  ;;  %v4346_v34 = vld [vmem:[#allocation7_spill] sm:$0xff] }
 0x12e   : > { %970 = vrot.lane.b32.xlu0 %v2744_v4, %s2276_s22 }
 0x12f   : > { %v811_v0 = vpop.permute.xlu1 %810 }
 0x130   : > { %v813_v48 = vpop.permute.xlu0 %812  ;;  %v3342_v11 = vsel %vm1410_vm6, %v1399_v24, %v811_v0  ;;  %v4349_v24 = vld [vmem:[#allocation76_spill] sm:$0xff] }
 0x131   : > { %v3345_v4 = vsel %vm1410_vm6, %v1400_v55, %v813_v48  ;;  %1002 = vrot.lane.b32.xlu1 %v2848_v29, %s2276_s22  ;;  %v4350_v55 = vld [vmem:[#allocation35_spill] sm:$0xff]  ;;  %v1405_v48 = vsel %vm1377_vm5, %v1372_v13, %v3149_v19 }
 0x132   : > { %1064 = vrot.lane.b32.xlu0 %v2404_v52, %s2277_s23  ;;  %v1373_v0 = vsel %vm1344_vm4, %v4350_v55, %v4349_v24 }
 0x133   : > { %v815_v30 = vpop.permute.xlu1 %814  ;;  %v1406_v26 = vsel %vm1377_vm5, %v1373_v0, %v4351_v54  ;;  %v4367_v54 = vld [vmem:[#allocation44_spill] sm:$0xff] }
 0x134   : > { %v817_v33 = vpop.permute.xlu0 %816  ;;  %v3362_v29 = vsel %vm1410_vm6, %v1401_v9, %v815_v30  ;;  %v4354_v9 = vld [vmem:[#allocation32_spill] sm:$0xff]  ;;  %v4357_v30 = vld [vmem:[#allocation78_spill] sm:$0xff] }
 0x135   : > { %v3365_v52 = vsel %vm1410_vm6, %v1402_v15, %v817_v33  ;;  %1096 = vrot.lane.b32.xlu1 %v4337_v42, %s2277_s23  ;;  %v4356_v15 = vld [vmem:[#allocation34_spill] sm:$0xff] }
 0x136   : > { %1066 = vrot.lane.b32.xlu0 %v2401_v51, %s2277_s23  ;;  %v1374_v19 = vsel %vm1344_vm4, %v4356_v15, %v4355_v60  ;;  %v4358_v33 = vld [vmem:[#allocation38_spill] sm:$0xff] }
 0x137   : > { %v819_v18 = vpop.permute.xlu1 %818  ;;  %v1375_v38 = vsel %vm1344_vm4, %v4358_v33, %v4357_v30  ;;  %v4369_v30 = vld [vmem:[#allocation45_spill] sm:$0xff] }
 0x138   : > { %v821_v25 = vpop.permute.xlu0 %820  ;;  %v3382_v3 = vsel %vm1410_vm6, %v1403_v1, %v819_v18  ;;  %v1408_v37 = vsel %vm1377_vm5, %v1375_v38, %v3159_v43  ;;  %v4362_v18 = vld [vmem:[#allocation8_spill] sm:$0xff] }
 0x139   : > { %v3385_v51 = vsel %vm1410_vm6, %v1404_v61, %v821_v25  ;;  %1098 = vrot.lane.b32.xlu1 %v4341_v44, %s2277_s23  ;;  %v4359_v44 = vld [vmem:[#allocation92_spill] sm:$0xff]  ;;  %v4363_v25 = vld [vmem:[#allocation79_spill] sm:$0xff] }
 0x13a   : > { %4345 = vst [vmem:[#allocation71_spill] sm:$0xff] %v3385_v51  ;;  %1160 = vrot.lane.b32.xlu0 %v4346_v34, %s2278_s28  ;;  %v1407_v21 = vsel %vm1377_vm5, %v1374_v19, %v4359_v44 }
 0x13b   : > { %v823_v50 = vpop.permute.xlu1 %822 }
 0x13c   : > { %v825_v42 = vpop.permute.xlu0 %824  ;;  %v3402_v47 = vsel %vm1410_vm6, %v1405_v48, %v823_v50  ;;  %v4366_v48 = vld [vmem:[#allocation33_spill] sm:$0xff] }
 0x13d   : > { %4352 = vst [vmem:[#allocation72_spill] sm:$0xff] %v3402_v47  ;;  %v3405_v22 = vsel %vm1410_vm6, %v1406_v26, %v825_v42  ;;  %1192 = vrot.lane.b32.xlu1 %v4354_v9, %s2278_s28  ;;  %v4368_v42 = vld [vmem:[#allocation56_spill] sm:$0xff] }
 0x13e   : > { %4353 = vst [vmem:[#allocation27_spill] sm:$0xff] %v3405_v22  ;;  %876 = vrot.lane.b32.xlu0 %v4346_v34, %s2275_s21  ;;  %v4364_v34 = vld [vmem:[#allocation39_spill] sm:$0xff] }
 0x13f   : > { %v827_v5 = vpop.permute.xlu1 %826  ;;  %v1376_v58 = vsel %vm1344_vm4, %v4364_v34, %v4363_v25 }
 0x140   : > { %v829_v1 = vpop.permute.xlu0 %828  ;;  %v3422_v23 = vsel %vm1410_vm6, %v1407_v21, %v827_v5  ;;  %v1409_v43 = vsel %vm1377_vm5, %v1376_v58, %v3165_v46  ;;  %v4370_v21 = vld [vmem:[#allocation57_spill] sm:$0xff] }
 0x141   : > { %4360 = vst [vmem:[#allocation90_spill] sm:$0xff] %v3422_v23  ;;  %v3425_v61 = vsel %vm1410_vm6, %v1408_v37, %v829_v1  ;;  %908 = vrot.lane.b32.xlu1 %v4354_v9, %s2275_s21  ;;  %v4378_v23 = vld [vmem:[#allocation10_spill] sm:$0xff] }
 0x142   : > { %4361 = vst [vmem:[#allocation91_spill] sm:$0xff] %v3425_v61  ;;  %1162 = vrot.lane.b32.xlu0 %v4362_v18, %s2278_s28  ;;  %v4377_v61 = vld [vmem:[#allocation3_spill] sm:$0xff] }
 0x143   : > { %v831_v13 = vpop.permute.xlu1 %830 }
 0x144   : > { %v865_v24 = vpop.permute.xlu0 %864  ;;  %v3437_v0 = vsel %vm1410_vm6, %v1409_v43, %v831_v13  ;;  %v4371_v43 = vld [vmem:[#allocation9_spill] sm:$0xff] }
 0x145   : > { %4365 = vst [vmem:[#allocation73_spill] sm:$0xff] %v3437_v0  ;;  %1194 = vrot.lane.b32.xlu1 %v4366_v48, %s2278_s28  ;;  %v4376_v0 = vld [vmem:[#allocation14_spill] sm:$0xff] }
 0x146   : > { %1256 = vrot.lane.b32.xlu0 %v4367_v54, %s2279_s8 }
 0x147   : > { %v3443_v26 = vpop.permute.xlu1 %866 }
 0x148   : > { %v3445_v50 = vpop.permute.xlu0 %868 }
 0x149   : > { %1288 = vrot.lane.b32.xlu1 %v4368_v42, %s2279_s8 }
 0x14a   : > { %878 = vrot.lane.b32.xlu0 %v4362_v18, %s2275_s21 }
 0x14b   : > { %v3451_v46 = vpop.permute.xlu1 %870 }
 0x14c   : > { %v3453_v9 = vpop.permute.xlu0 %872 }
 0x14d   : > { %910 = vrot.lane.b32.xlu1 %v4366_v48, %s2275_s21  ;;  %v4372_v48 = vld [vmem:[#allocation61_spill] sm:$0xff] }
 0x14e   : > { %972 = vrot.lane.b32.xlu0 %v4367_v54, %s2276_s22  ;;  %v2241_v54 = vunpack.i.l.bf16 %v4372_v48  ;;  %v2242_v51 = vunpack.i.h.bf16 %v4372_v48  ;;  %v4382_v48 = vld [vmem:[#allocation2_spill] sm:$0xff] }
 0x14f   : > { %v3459_v60 = vpop.permute.xlu1 %874 }
 0x150   : > { %v897_v19 = vpop.permute.xlu0 %896  ;;  %v1345_v35 = vsel %vm1344_vm4, %v4377_v61, %v2241_v54 }
 0x151   : > { %1004 = vrot.lane.b32.xlu1 %v4368_v42, %s2276_s22  ;;  %v4373_v42 = vld [vmem:[#allocation36_spill] sm:$0xff] }
 0x152   : > { %1258 = vrot.lane.b32.xlu0 %v4369_v30, %s2279_s8 }
 0x153   : > { %v3465_v38 = vpop.permute.xlu1 %898 }
 0x154   : > { %v961_v44 = vpop.permute.xlu0 %960 }
 0x155   : > { %1290 = vrot.lane.b32.xlu1 %v4370_v21, %s2279_s8 }
 0x156   : > { %974 = vrot.lane.b32.xlu0 %v4369_v30, %s2276_s22 }
 0x157   : > { %v993_v37 = vpop.permute.xlu1 %992 }
 0x158   : > { %v3471_v5 = vpop.permute.xlu0 %962 }
 0x159   : > { %1006 = vrot.lane.b32.xlu1 %v4370_v21, %s2276_s22 }
 0x15a   : > { %1068 = vrot.lane.b32.xlu0 %v2421_v59, %s2277_s23 }
 0x15b   : > { %v3477_v1 = vpop.permute.xlu1 %994 }
 0x15c   : > { %v1057_v18 = vpop.permute.xlu0 %1056 }
 0x15d   : > { %1100 = vrot.lane.b32.xlu1 %v4343_v12, %s2277_s23 }
 0x15e   : > { %1070 = vrot.lane.b32.xlu0 %v2429_v6, %s2277_s23  ;;  %v4374_v6 = vld [vmem:[#allocation80_spill] sm:$0xff] }
 0x15f   : > { %v1089_v25 = vpop.permute.xlu1 %1088  ;;  %v2246_v12 = vunpack.i.l.bf16 %v4374_v6 }
 0x160   : > { %v1059_v58 = vpop.permute.xlu0 %1058 }
 0x161   : > { %1102 = vrot.lane.b32.xlu1 %v4348_v49, %s2277_s23  ;;  %v4375_v49 = vld [vmem:[#allocation67_spill] sm:$0xff]  ;;  %v1378_v22 = vsel %vm1377_vm5, %v1345_v35, %v2246_v12  ;;  %v4380_v12 = vld [vmem:[#allocation37_spill] sm:$0xff] }
 0x162   : > { %1164 = vrot.lane.b32.xlu0 %v4371_v43, %s2278_s28  ;;  %v1361_v14 = vsel %vm1344_vm4, %v4376_v0, %v4375_v49  ;;  %v1411_v8 = vsel %vm1410_vm6, %v1378_v22, %v3167_v45  ;;  %v4381_v45 = vld [vmem:[#allocation46_spill] sm:$0xff] }
 0x163   : > { %v3487_v13 = vpop.permute.xlu1 %1090 }
 0x164   : > { %v1153_v59 = vpop.permute.xlu0 %1152 }
 0x165   : > { %1196 = vrot.lane.b32.xlu1 %v4373_v42, %s2278_s28 }
 0x166   : > { %880 = vrot.lane.b32.xlu0 %v4371_v43, %s2275_s21  ;;  %v4379_v43 = vld [vmem:[#allocation86_spill] sm:$0xff] }
 0x167   : > { %v1185_v30 = vpop.permute.xlu1 %1184  ;;  %v1394_v57 = vsel %vm1377_vm5, %v1361_v14, %v4379_v43  ;;  %v1346_v43 = vsel %vm1344_vm4, %v4382_v48, %v2242_v51 }
 0x168   : > { %v3495_v21 = vpop.permute.xlu0 %900  ;;  %v1427_v49 = vsel %vm1410_vm6, %v1394_v57, %v3300_v36  ;;  %v2247_v57 = vunpack.i.h.bf16 %v4374_v6  ;;  %v4383_v6 = vld [vmem:[#allocation58_spill] sm:$0xff] }
 0x169   : > { %912 = vrot.lane.b32.xlu1 %v4373_v42, %s2275_s21  ;;  %v1444_v42 = vsel %vm1443_vm7, %v1411_v8, %v865_v24  ;;  %v1460_v41 = vsel %vm1443_vm7, %v1427_v49, %v897_v19 }
 0x16a   : > { %1166 = vrot.lane.b32.xlu0 %v4378_v23, %s2278_s28  ;;  %v1477_v14 = vsel %vm1476_vm8, %v1444_v42, %v961_v44  ;;  %v1493_v35 = vsel %vm1476_vm8, %v1460_v41, %v993_v37  ;;  %v4385_v42 = vld [vmem:[#allocation68_spill] sm:$0xff] }
 0x16b   : > { %v1155_v54 = vpop.permute.xlu1 %1154  ;;  %v1510_v8 = vsel %vm1509_vm9, %v1477_v14, %v1057_v18  ;;  %v1526_v36 = vsel %vm1509_vm9, %v1493_v35, %v1089_v25  ;;  %v1379_v18 = vsel %vm1377_vm5, %v1346_v43, %v2247_v57  ;;  %v4384_v25 = vld [vmem:[#allocation93_spill] sm:$0xff]  ;;  %v4387_v57 = vld [vmem:[#allocation87_spill] sm:$0xff] }
 0x16c   : > { %v1187_v47 = vpop.permute.xlu0 %1186  ;;  %v1543_v22 = vsel %vm1542_vm10, %v1510_v8, %v1153_v59  ;;  %v1559_v24 = vsel %vm1542_vm10, %v1526_v36, %v1185_v30  ;;  %v1412_v59 = vsel %vm1410_vm6, %v1379_v18, %v4384_v25  ;;  %v4386_v14 = vld [vmem:[#allocation13_spill] sm:$0xff]  ;;  %v4390_v25 = vld [vmem:[#allocation11_spill] sm:$0xff] }
 0x16d   : > { %1198 = vrot.lane.b32.xlu1 %v4380_v12, %s2278_s28  ;;  %v1445_v51 = vsel %vm1443_vm7, %v1412_v59, %v3443_v26  ;;  %v1362_v35 = vsel %vm1344_vm4, %v4386_v14, %v4385_v42  ;;  %v4392_v42 = vld [vmem:[#allocation6_spill] sm:$0xff] }
 0x16e   : > { %1260 = vrot.lane.b32.xlu0 %v4381_v45, %s2279_s8  ;;  %v1395_v8 = vsel %vm1377_vm5, %v1362_v35, %v4387_v57 }
 0x16f   : > { %v1249_v19 = vpop.permute.xlu1 %1248  ;;  %v1428_v26 = vsel %vm1410_vm6, %v1395_v8, %v3309_v63 }
 0x170   : > { %v1281_v44 = vpop.permute.xlu0 %1280  ;;  %v1576_v41 = vsel %vm1575_vm11, %v1543_v22, %v1249_v19 }
 0x171   : > { %v1592_v37 = vsel %vm1575_vm11, %v1559_v24, %v1281_v44  ;;  %1292 = vrot.lane.b32.xlu1 %v4383_v6, %s2279_s8  ;;  %2159 = vmatprep.mubr.msk.f32.mxu0 %vm1620_vm12, %v1576_v41 }
 0x172   : > { %882 = vrot.lane.b32.xlu0 %v4378_v23, %s2275_s21  ;;  %2183 = vmatprep.mubr.msk.f32.mxu1 %vm1620_vm12, %v1592_v37  ;;  %v1478_v23 = vsel %vm1476_vm8, %v1445_v51, %v3471_v5  ;;  %v1461_v5 = vsel %vm1443_vm7, %v1428_v26, %v3465_v38  ;;  %v4389_v37 = vld [vmem:[#allocation59_spill] sm:$0xff] }
 0x173   : > { %v3540_v30 = vpop.permute.xlu1 %902  ;;  %v1511_v36 = vsel %vm1509_vm9, %v1478_v23, %v1059_v58  ;;  %v4388_v58 = vld [vmem:[#allocation47_spill] sm:$0xff]  ;;  %v4393_v23 = vld [vmem:[#allocation69_spill] sm:$0xff] }
 0x174   : > { %v965_v49 = vpop.permute.xlu0 %964  ;;  %v1544_v22 = vsel %vm1542_vm10, %v1511_v36, %v1155_v54  ;;  %v4397_v36 = vld [vmem:[#allocation88_spill] sm:$0xff] }
 0x175   : > { %914 = vrot.lane.b32.xlu1 %v4380_v12, %s2275_s21 }
 0x176   : > { %976 = vrot.lane.b32.xlu0 %v4381_v45, %s2276_s22  ;;  %v1494_v45 = vsel %vm1476_vm8, %v1461_v5, %v3477_v1 }
 0x177   : > { %v997_v24 = vpop.permute.xlu1 %996  ;;  %v1527_v63 = vsel %vm1509_vm9, %v1494_v45, %v3487_v13 }
 0x178   : > { %v1251_v19 = vpop.permute.xlu0 %1250  ;;  %v1560_v54 = vsel %vm1542_vm10, %v1527_v63, %v1187_v47 }
 0x179   : > { %v1577_v12 = vsel %vm1575_vm11, %v1544_v22, %v1251_v19  ;;  %1008 = vrot.lane.b32.xlu1 %v4383_v6, %s2276_s22  ;;  %v4398_v22 = vld [vmem:[#allocation94_spill] sm:$0xff] }
 0x17a   : > { %1262 = vrot.lane.b32.xlu0 %v4388_v58, %s2279_s8  ;;  %2160 = vmatmul.mubr.msk.f32.vlgmr.msra.gmra.mrb[0].mxu0 %vm1620_vm12, %v1577_v12 }
 0x17b   : > { %v1283_v44 = vpop.permute.xlu1 %1282 }
 0x17c   : > { %v967_v38 = vpop.permute.xlu0 %966  ;;  %v1593_v41 = vsel %vm1575_vm11, %v1560_v54, %v1283_v44 }
 0x17d   : > { %1294 = vrot.lane.b32.xlu1 %v4389_v37, %s2279_s8  ;;  %2184 = vmatmul.mubr.msk.f32.vlgmr.msra.gmra.mrb[0].mxu1 %vm1620_vm12, %v1593_v41  ;;  %v4399_v41 = vld [vmem:[#allocation12_spill] sm:$0xff] }
 0x17e   : > { %978 = vrot.lane.b32.xlu0 %v4388_v58, %s2276_s22 }
 0x17f   : > { %v999_v1 = vpop.permute.xlu1 %998 }
 0x180   : > { %v1061_v43 = vpop.permute.xlu0 %1060 }
 0x181   : > { %1010 = vrot.lane.b32.xlu1 %v4389_v37, %s2276_s22 }
 0x182   : > { %1072 = vrot.lane.b32.xlu0 %v2441_v10, %s2277_s23  ;;  %v4391_v10 = vld [vmem:[#allocation65_spill] sm:$0xff] }
 0x183   : > { %v1093_v47 = vpop.permute.xlu1 %1092  ;;  %v1347_v35 = vsel %vm1344_vm4, %v4392_v42, %v4391_v10  ;;  %v4400_v42 = vld [vmem:[#allocation64_spill] sm:$0xff] }
 0x184   : > { %v1063_v13 = vpop.permute.xlu0 %1062 }
 0x185   : > { %1104 = vrot.lane.b32.xlu1 %v4350_v55, %s2277_s23  ;;  %v4394_v55 = vld [vmem:[#allocation17_spill] sm:$0xff] }
 0x186   : > { %1074 = vrot.lane.b32.xlu0 %v2451_v17, %s2277_s23  ;;  %v1363_v57 = vsel %vm1344_vm4, %v4394_v55, %v4393_v23  ;;  %v4395_v17 = vld [vmem:[#allocation40_spill] sm:$0xff] }
 0x187   : > { %v1095_v6 = vpop.permute.xlu1 %1094  ;;  %v1396_v26 = vsel %vm1377_vm5, %v1363_v57, %v4397_v36  ;;  %v4402_v57 = vld [vmem:[#allocation41_spill] sm:$0xff]  ;;  %v4405_v36 = vld [vmem:[#allocation70_spill] sm:$0xff] }
 0x188   : > { %v1157_v18 = vpop.permute.xlu0 %1156  ;;  %v1429_v5 = vsel %vm1410_vm6, %v1396_v26, %v3311_v40  ;;  %v4406_v26 = vld [vmem:[#allocation16_spill] sm:$0xff] }
 0x189   : > { %1106 = vrot.lane.b32.xlu1 %v4356_v15, %s2277_s23  ;;  %v4396_v15 = vld [vmem:[#allocation81_spill] sm:$0xff]  ;;  %v1462_v63 = vsel %vm1443_vm7, %v1429_v5, %v3495_v21  ;;  %v4407_v5 = vld [vmem:[#allocation60_spill] sm:$0xff] }
 0x18a   : > { %1168 = vrot.lane.b32.xlu0 %v4390_v25, %s2278_s28  ;;  %v1380_v8 = vsel %vm1377_vm5, %v1347_v35, %v4396_v15  ;;  %v1495_v44 = vsel %vm1476_vm8, %v1462_v63, %v997_v24  ;;  %v4401_v35 = vld [vmem:[#allocation5_spill] sm:$0xff] }
 0x18b   : > { %v1189_v59 = vpop.permute.xlu1 %1188  ;;  %v1413_v19 = vsel %vm1410_vm6, %v1380_v8, %v4398_v22  ;;  %v1528_v37 = vsel %vm1509_vm9, %v1495_v44, %v1093_v47  ;;  %v1348_v23 = vsel %vm1344_vm4, %v4401_v35, %v4400_v42  ;;  %v4404_v47 = vld [vmem:[#allocation84_spill] sm:$0xff]  ;;  %v1364_v22 = vsel %vm1344_vm4, %v4406_v26, %v4405_v36 }
 0x18c   : > { %v3590_v51 = vpop.permute.xlu0 %904  ;;  %v1446_v58 = vsel %vm1443_vm7, %v1413_v19, %v3445_v50  ;;  %v1561_v50 = vsel %vm1542_vm10, %v1528_v37, %v1189_v59 }
 0x18d   : > { %1200 = vrot.lane.b32.xlu1 %v4395_v17, %s2278_s28  ;;  %v1479_v54 = vsel %vm1476_vm8, %v1446_v58, %v965_v49  ;;  %v4408_v58 = vld [vmem:[#allocation89_spill] sm:$0xff] }
 0x18e   : > { %884 = vrot.lane.b32.xlu0 %v4390_v25, %s2275_s21  ;;  %v1512_v40 = vsel %vm1509_vm9, %v1479_v54, %v1061_v43  ;;  %v4403_v43 = vld [vmem:[#allocation48_spill] sm:$0xff] }
 0x18f   : > { %v1159_v12 = vpop.permute.xlu1 %1158  ;;  %v1545_v25 = vsel %vm1542_vm10, %v1512_v40, %v1157_v18  ;;  %v1381_v18 = vsel %vm1377_vm5, %v1348_v23, %v4404_v47  ;;  %v4411_v23 = vld [vmem:[#allocation15_spill] sm:$0xff] }
 0x190   : > { %v1191_v45 = vpop.permute.xlu0 %1190  ;;  %v1414_v59 = vsel %vm1410_vm6, %v1381_v18, %v3186_v16  ;;  %v1397_v16 = vsel %vm1377_vm5, %v1364_v22, %v4408_v58  ;;  %v4415_v58 = vld [vmem:[#allocation50_spill] sm:$0xff] }
 0x191   : > { %916 = vrot.lane.b32.xlu1 %v4395_v17, %s2275_s21  ;;  %v1447_v8 = vsel %vm1443_vm7, %v1414_v59, %v3451_v46  ;;  %v1430_v46 = vsel %vm1410_vm6, %v1397_v16, %v3322_v31 }
 0x192   : > { %1170 = vrot.lane.b32.xlu0 %v4399_v41, %s2278_s28  ;;  %v1480_v19 = vsel %vm1476_vm8, %v1447_v8, %v967_v38  ;;  %v1463_v38 = vsel %vm1443_vm7, %v1430_v46, %v3540_v30  ;;  %v1464_v8 = vsel %vm1443_vm7, %v3325_v7, %v3590_v51  ;;  %v4414_v51 = vld [vmem:[#allocation43_spill] sm:$0xff]  ;;  %v1449_v46 = vsel %vm1443_vm7, %v3206_v62, %v3459_v60 }
 0x193   : > { %v1253_v10 = vpop.permute.xlu1 %1252  ;;  %v1513_v63 = vsel %vm1509_vm9, %v1480_v19, %v1063_v13 }
 0x194   : > { %v1285_v21 = vpop.permute.xlu0 %1284  ;;  %v1578_v49 = vsel %vm1575_vm11, %v1545_v25, %v1253_v10  ;;  %v1546_v54 = vsel %vm1542_vm10, %v1513_v63, %v1159_v12  ;;  %v1496_v25 = vsel %vm1476_vm8, %v1463_v38, %v999_v1  ;;  %v4409_v1 = vld [vmem:[#allocation49_spill] sm:$0xff] }
 0x195   : > { %v1594_v24 = vsel %vm1575_vm11, %v1561_v50, %v1285_v21  ;;  %1202 = vrot.lane.b32.xlu1 %v4402_v57, %s2278_s28  ;;  %2162 = vmatprep.mubr.msk.f32.mxu0 %vm1620_vm12, %v1578_v49  ;;  %v1529_v13 = vsel %vm1509_vm9, %v1496_v25, %v1095_v6  ;;  %v4410_v6 = vld [vmem:[#allocation62_spill] sm:$0xff] }
 0x196   : > { %1264 = vrot.lane.b32.xlu0 %v4403_v43, %s2279_s8  ;;  %2186 = vmatprep.mubr.msk.f32.mxu1 %vm1620_vm12, %v1594_v24  ;;  %v1562_v31 = vsel %vm1542_vm10, %v1529_v13, %v1191_v45 }
 0x197   : > { %v3639_v17 = vpop.permute.xlu1 %906 }
 0x198   : > { %v969_v15 = vpop.permute.xlu0 %968  ;;  %v1465_v13 = vsel %vm1443_vm7, %v3342_v11, %v3639_v17  ;;  %v4417_v17 = vld [vmem:[#allocation51_spill] sm:$0xff] }
 0x199   : > { %1296 = vrot.lane.b32.xlu1 %v4407_v5, %s2279_s8 }
 0x19a   : > { %886 = vrot.lane.b32.xlu0 %v4399_v41, %s2275_s21 }
 0x19b   : > { %v1001_v44 = vpop.permute.xlu1 %1000 }
 0x19c   : > { %v1255_v40 = vpop.permute.xlu0 %1254 }
 0x19d   : > { %v1579_v37 = vsel %vm1575_vm11, %v1546_v54, %v1255_v40  ;;  %918 = vrot.lane.b32.xlu1 %v4402_v57, %s2275_s21 }
 0x19e   : > { %980 = vrot.lane.b32.xlu0 %v4403_v43, %s2276_s22  ;;  %2163 = vmatmul.mubr.msk.f32.gmra.mrb[2].mxu0 %vm1620_vm12, %v1579_v37  ;;  %v1448_v43 = vsel %vm1443_vm7, %v3189_v2, %v3453_v9  ;;  %v1497_v9 = vsel %vm1476_vm8, %v1464_v8, %v1001_v44  ;;  %v4416_v44 = vld [vmem:[#allocation63_spill] sm:$0xff] }
 0x19f   : > { %v1287_v12 = vpop.permute.xlu1 %1286 }
 0x1a0   : > { %v971_v41 = vpop.permute.xlu0 %970  ;;  %v1595_v30 = vsel %vm1575_vm11, %v1562_v31, %v1287_v12 }
 0x1a1   : > { %1012 = vrot.lane.b32.xlu1 %v4407_v5, %s2276_s22  ;;  %2187 = vmatmul.mubr.msk.f32.gmra.mrb[2].mxu1 %vm1620_vm12, %v1595_v30  ;;  %v1482_v54 = vsel %vm1476_vm8, %v1449_v46, %v971_v41 }
 0x1a2   : > { %1266 = vrot.lane.b32.xlu0 %v4409_v1, %s2279_s8 }
 0x1a3   : > { %v1003_v50 = vpop.permute.xlu1 %1002 }
 0x1a4   : > { %v1065_v10 = vpop.permute.xlu0 %1064  ;;  %v1498_v60 = vsel %vm1476_vm8, %v1465_v13, %v1003_v50 }
 0x1a5   : > { %1298 = vrot.lane.b32.xlu1 %v4410_v6, %s2279_s8 }
 0x1a6   : > { %982 = vrot.lane.b32.xlu0 %v4409_v1, %s2276_s22 }
 0x1a7   : > { %v1097_v45 = vpop.permute.xlu1 %1096 }
 0x1a8   : > { %v1067_v21 = vpop.permute.xlu0 %1066  ;;  %v1530_v36 = vsel %vm1509_vm9, %v1497_v9, %v1097_v45 }
 0x1a9   : > { %1014 = vrot.lane.b32.xlu1 %v4410_v6, %s2276_s22  ;;  %v1515_v40 = vsel %vm1509_vm9, %v1482_v54, %v1067_v21 }
 0x1aa   : > { %1076 = vrot.lane.b32.xlu0 %v2471_v28, %s2277_s23 }
 0x1ab   : > { %v1099_v49 = vpop.permute.xlu1 %1098 }
 0x1ac   : > { %v1161_v24 = vpop.permute.xlu0 %1160  ;;  %v1531_v31 = vsel %vm1509_vm9, %v1498_v60, %v1099_v49 }
 0x1ad   : > { %1108 = vrot.lane.b32.xlu1 %v4358_v33, %s2277_s23  ;;  %v1481_v33 = vsel %vm1476_vm8, %v1448_v43, %v969_v15  ;;  %v4413_v15 = vld [vmem:[#allocation18_spill] sm:$0xff] }
 0x1ae   : > { %1078 = vrot.lane.b32.xlu0 %v2468_v27, %s2277_s23  ;;  %v4412_v27 = vld [vmem:[#allocation42_spill] sm:$0xff] }
 0x1af   : > { %v1193_v42 = vpop.permute.xlu1 %1192 }
 0x1b0   : > { %v3686_v35 = vpop.permute.xlu0 %876  ;;  %v1563_v22 = vsel %vm1542_vm10, %v1530_v36, %v1193_v42 }
 0x1b1   : > { %1110 = vrot.lane.b32.xlu1 %v4364_v34, %s2277_s23  ;;  %v1514_v34 = vsel %vm1509_vm9, %v1481_v33, %v1065_v10  ;;  %v4418_v10 = vld [vmem:[#allocation66_spill] sm:$0xff]  ;;  %v1450_v8 = vsel %vm1443_vm7, %v3209_v53, %v3686_v35 }
 0x1b2   : > { %1172 = vrot.lane.b32.xlu0 %v4411_v23, %s2278_s28  ;;  %v1547_v47 = vsel %vm1542_vm10, %v1514_v34, %v1161_v24  ;;  %v4419_v24 = vld [vmem:[#allocation83_spill] sm:$0xff] }
 0x1b3   : > { %v3692_v57 = vpop.permute.xlu1 %908  ;;  %v566_v42 = vrot.slane %v4419_v24, 1 }
 0x1b4   : > { %v1163_v28 = vpop.permute.xlu0 %1162 }
 0x1b5   : > { %1204 = vrot.lane.b32.xlu1 %v4412_v27, %s2278_s28  ;;  %v1548_v38 = vsel %vm1542_vm10, %v1515_v40, %v1163_v28 }
 0x1b6   : > { %888 = vrot.lane.b32.xlu0 %v4411_v23, %s2275_s21  ;;  %v4420_v23 = vld [vmem:[#allocation85_spill] sm:$0xff] }
 0x1b7   : > { %v1195_v18 = vpop.permute.xlu1 %1194  ;;  %v567_v28 = vrot.slane %v4420_v23, 1 }
 0x1b8   : > { %v1257_v59 = vpop.permute.xlu0 %1256  ;;  %v1564_v12 = vsel %vm1542_vm10, %v1531_v31, %v1195_v18  ;;  %v4422_v18 = vld [vmem:[#allocation82_spill] sm:$0xff] }
 0x1b9   : > { %v1580_v2 = vsel %vm1575_vm11, %v1547_v47, %v1257_v59  ;;  %920 = vrot.lane.b32.xlu1 %v4412_v27, %s2275_s21  ;;  %v568_v27 = vsel %vm402_vm1, %v566_v42, %v567_v28 }
 0x1ba   : > { %1174 = vrot.lane.b32.xlu0 %v4413_v15, %s2278_s28  ;;  %2165 = vmatprep.mubr.msk.f32.mxu0 %vm1620_vm12, %v1580_v2 }
 0x1bb   : > { %v1289_v19 = vpop.permute.xlu1 %1288 }
 0x1bc   : > { %v3716_v5 = vpop.permute.xlu0 %878  ;;  %v1596_v7 = vsel %vm1575_vm11, %v1563_v22, %v1289_v19 }
 0x1bd   : > { %1206 = vrot.lane.b32.xlu1 %v4414_v51, %s2278_s28  ;;  %2189 = vmatprep.mubr.msk.f32.mxu1 %vm1620_vm12, %v1596_v7  ;;  %v1466_v7 = vsel %vm1443_vm7, %v3345_v4, %v3692_v57 }
 0x1be   : > { %1268 = vrot.lane.b32.xlu0 %v4415_v58, %s2279_s8 }
 0x1bf   : > { %v3724_v16 = vpop.permute.xlu1 %910 }
 0x1c0   : > { %v973_v63 = vpop.permute.xlu0 %972 }
 0x1c1   : > { %1300 = vrot.lane.b32.xlu1 %v4416_v44, %s2279_s8  ;;  %v1483_v2 = vsel %vm1476_vm8, %v1450_v8, %v973_v63  ;;  %v572_v63 = vrot.slane %v4420_v23, 2  ;;  %v4430_v8 = vld [vmem:[#allocation54_spill] sm:$0xff] }
 0x1c2   : > { %890 = vrot.lane.b32.xlu0 %v4413_v15, %s2275_s21 }
 0x1c3   : > { %v1005_v37 = vpop.permute.xlu1 %1004 }
 0x1c4   : > { %v1259_v25 = vpop.permute.xlu0 %1258  ;;  %v1499_v35 = vsel %vm1476_vm8, %v1466_v7, %v1005_v37  ;;  %v4432_v7 = vld [vmem:[#allocation55_spill] sm:$0xff] }
 0x1c5   : > { %v1581_v62 = vsel %vm1575_vm11, %v1548_v38, %v1259_v25  ;;  %922 = vrot.lane.b32.xlu1 %v4414_v51, %s2275_s21  ;;  %v4424_v51 = vld [vmem:[#allocation20_spill] sm:$0xff] }
 0x1c6   : > { %984 = vrot.lane.b32.xlu0 %v4415_v58, %s2276_s22  ;;  %2166 = vmatmul.mubr.msk.f32.gmra.mrb[4].mxu0 %vm1620_vm12, %v1581_v62  ;;  %v571_v58 = vrot.slane %v4419_v24, 2  ;;  %v4425_v38 = vld [vmem:[#allocation52_spill] sm:$0xff]  ;;  %v1451_v62 = vsel %vm1443_vm7, %v3226_v32, %v3716_v5 }
 0x1c7   : > { %v1291_v41 = vpop.permute.xlu1 %1290 }
 0x1c8   : > { %v975_v30 = vpop.permute.xlu0 %974  ;;  %v1597_v11 = vsel %vm1575_vm11, %v1564_v12, %v1291_v41  ;;  %v573_v37 = vsel %vm483_vm2, %v571_v58, %v572_v63 }
 0x1c9   : > { %1016 = vrot.lane.b32.xlu1 %v4416_v44, %s2276_s22  ;;  %2190 = vmatmul.mubr.msk.f32.gmra.mrb[4].mxu1 %vm1620_vm12, %v1597_v11  ;;  %v1484_v60 = vsel %vm1476_vm8, %v1451_v62, %v975_v30 }
 0x1ca   : > { %1270 = vrot.lane.b32.xlu0 %v4417_v17, %s2279_s8 }
 0x1cb   : > { %v1007_v1 = vpop.permute.xlu1 %1006 }
 0x1cc   : > { %v1069_v50 = vpop.permute.xlu0 %1068 }
 0x1cd   : > { %1302 = vrot.lane.b32.xlu1 %v4418_v10, %s2279_s8  ;;  %v1516_v9 = vsel %vm1509_vm9, %v1483_v2, %v1069_v50 }
 0x1ce   : > { %986 = vrot.lane.b32.xlu0 %v4417_v17, %s2276_s22  ;;  %v1467_v17 = vsel %vm1443_vm7, %v3362_v29, %v3724_v16  ;;  %v4426_v16 = vld [vmem:[#allocation53_spill] sm:$0xff] }
 0x1cf   : > { %v1101_v6 = vpop.permute.xlu1 %1100  ;;  %v1500_v32 = vsel %vm1476_vm8, %v1467_v17, %v1007_v1 }
 0x1d0   : > { %v1071_v45 = vpop.permute.xlu0 %1070  ;;  %v1532_v46 = vsel %vm1509_vm9, %v1499_v35, %v1101_v6 }
 0x1d1   : > { %1018 = vrot.lane.b32.xlu1 %v4418_v10, %s2276_s22  ;;  %v1517_v31 = vsel %vm1509_vm9, %v1484_v60, %v1071_v45 }
 0x1d2   : > { %1080 = vrot.lane.b32.xlu0 %v4376_v0, %s2277_s23  ;;  %v4421_v0 = vld [vmem:[#allocation19_spill] sm:$0xff] }
 0x1d3   : > { %v1103_v21 = vpop.permute.xlu1 %1102 }
 0x1d4   : > { %v1165_v49 = vpop.permute.xlu0 %1164  ;;  %v1533_v5 = vsel %vm1509_vm9, %v1500_v32, %v1103_v21 }
 0x1d5   : > { %1112 = vrot.lane.b32.xlu1 %v4419_v24, %s2277_s23  ;;  %v1549_v36 = vsel %vm1542_vm10, %v1516_v9, %v1165_v49 }
 0x1d6   : > { %1082 = vrot.lane.b32.xlu0 %v4386_v14, %s2277_s23  ;;  %v4423_v14 = vrot.slane %v4422_v18, 7  ;;  %v4428_v18 = vld [vmem:[#allocation4_spill] sm:$0xff] }
 0x1d7   : > { %v1197_v43 = vpop.permute.xlu1 %1196 }
 0x1d8   : > { %v3768_v33 = vpop.permute.xlu0 %880  ;;  %v369_v59 = vsel %vm236_vm0, %v4423_v14, 0.0  ;;  %v1565_v4 = vsel %vm1542_vm10, %v1532_v46, %v1197_v43 }
 0x1d9   : > { %1114 = vrot.lane.b32.xlu1 %v4420_v23, %s2277_s23  ;;  %v569_v15 = vrot.slane %v369_v59, 1  ;;  %v574_v30 = vrot.slane %v369_v59, 2  ;;  %v2248_v23 = vpack.i.bf16 %v4382_v48, %v4377_v61  ;;  %v1452_v48 = vsel %vm1443_vm7, %v3229_v39, %v3768_v33  ;;  %v4429_v59 = vld [vmem:[#allocation22_spill] sm:$0xff] }
 0x1da   : > { %1176 = vrot.lane.b32.xlu0 %v4421_v0, %s2278_s28 }
 0x1db   : > { %v3775_v34 = vpop.permute.xlu1 %912  ;;  %v570_v54 = vsel %vm402_vm1, %v567_v28, %v569_v15  ;;  %v575_v1 = vsel %vm483_vm2, %v572_v63, %v574_v30 }
 0x1dc   : > { %v1167_v47 = vpop.permute.xlu0 %1166 }
 0x1dd   : > { %1208 = vrot.lane.b32.xlu1 %v568_v27, %s2278_s28  ;;  %v1550_v12 = vsel %vm1542_vm10, %v1517_v31, %v1167_v47  ;;  %v4427_v47 = vld [vmem:[#allocation21_spill] sm:$0xff] }
 0x1de   : > { %892 = vrot.lane.b32.xlu0 %v4421_v0, %s2275_s21 }
 0x1df   : > { %v1199_v22 = vpop.permute.xlu1 %1198 }
 0x1e0   : > { %v1261_v19 = vpop.permute.xlu0 %1260  ;;  %v1566_v10 = vsel %vm1542_vm10, %v1533_v5, %v1199_v22  ;;  %v4431_v22 = vld [vmem:[#allocation23_spill] sm:$0xff] }
 0x1e1   : > { %v1582_v53 = vsel %vm1575_vm11, %v1549_v36, %v1261_v19  ;;  %924 = vrot.lane.b32.xlu1 %v568_v27, %s2275_s21  ;;  %v1468_v36 = vsel %vm1443_vm7, %v3365_v52, %v3775_v34 }
 0x1e2   : > { %1178 = vrot.lane.b32.xlu0 %v4424_v51, %s2278_s28  ;;  %2168 = vmatprep.mubr.msk.f32.mxu0 %vm1620_vm12, %v1582_v53 }
 0x1e3   : > { %v1293_v57 = vpop.permute.xlu1 %1292 }
 0x1e4   : > { %v3803_v44 = vpop.permute.xlu0 %882  ;;  %v1598_v40 = vsel %vm1575_vm11, %v1565_v4, %v1293_v57 }
 0x1e5   : > { %1210 = vrot.lane.b32.xlu1 %v570_v54, %s2278_s28  ;;  %2192 = vmatprep.mubr.msk.f32.mxu1 %vm1620_vm12, %v1598_v40  ;;  %v1453_v63 = vsel %vm1443_vm7, %v3246_v20, %v3803_v44 }
 0x1e6   : > { %1272 = vrot.lane.b32.xlu0 %v4425_v38, %s2279_s8 }
 0x1e7   : > { %v3811_v25 = vpop.permute.xlu1 %914 }
 0x1e8   : > { %v977_v13 = vpop.permute.xlu0 %976 }
 0x1e9   : > { %1304 = vrot.lane.b32.xlu1 %v573_v37, %s2279_s8 }
 0x1ea   : > { %894 = vrot.lane.b32.xlu0 %v4424_v51, %s2275_s21 }
 0x1eb   : > { %v1009_v41 = vpop.permute.xlu1 %1008 }
 0x1ec   : > { %v1263_v11 = vpop.permute.xlu0 %1262  ;;  %v1501_v33 = vsel %vm1476_vm8, %v1468_v36, %v1009_v41 }
 0x1ed   : > { %v1583_v50 = vsel %vm1575_vm11, %v1550_v12, %v1263_v11  ;;  %926 = vrot.lane.b32.xlu1 %v570_v54, %s2275_s21 }
 0x1ee   : > { %2169 = vmatmul.mubr.msk.f32.gmra.mrb[6].mxu0 %vm1620_vm12, %v1583_v50  ;;  %988 = vrot.lane.b32.xlu0 %v4425_v38, %s2276_s22  ;;  %v1469_v38 = vsel %vm1443_vm7, %v3382_v3, %v3811_v25 }
 0x1ef   : > { %v1295_v6 = vpop.permute.xlu1 %1294 }
 0x1f0   : > { %v979_v45 = vpop.permute.xlu0 %978  ;;  %v1599_v29 = vsel %vm1575_vm11, %v1566_v10, %v1295_v6 }
 0x1f1   : > { %1020 = vrot.lane.b32.xlu1 %v573_v37, %s2276_s22  ;;  %2193 = vmatmul.mubr.msk.f32.gmra.mrb[6].mxu1 %vm1620_vm12, %v1599_v29  ;;  %v1486_v46 = vsel %vm1476_vm8, %v1453_v63, %v979_v45 }
 0x1f2   : > { %1274 = vrot.lane.b32.xlu0 %v4426_v16, %s2279_s8 }
 0x1f3   : > { %v1011_v21 = vpop.permute.xlu1 %1010 }
 0x1f4   : > { %v1073_v49 = vpop.permute.xlu0 %1072 }
 0x1f5   : > { %1306 = vrot.lane.b32.xlu1 %v575_v1, %s2279_s8 }
 0x1f6   : > { %990 = vrot.lane.b32.xlu0 %v4426_v16, %s2276_s22 }
 0x1f7   : > { %v1105_v24 = vpop.permute.xlu1 %1104 }
 0x1f8   : > { %v1075_v42 = vpop.permute.xlu0 %1074  ;;  %v1534_v19 = vsel %vm1509_vm9, %v1501_v33, %v1105_v24 }
 0x1f9   : > { %1022 = vrot.lane.b32.xlu1 %v575_v1, %s2276_s22  ;;  %v1519_v54 = vsel %vm1509_vm9, %v1486_v46, %v1075_v42 }
 0x1fa   : > { %1084 = vrot.lane.b32.xlu0 %v4394_v55, %s2277_s23  ;;  %v1485_v55 = vsel %vm1476_vm8, %v1452_v48, %v977_v13  ;;  %v1502_v13 = vsel %vm1476_vm8, %v1469_v38, %v1011_v21  ;;  %v4433_v21 = vld [vmem:[#allocation71_spill] sm:$0xff] }
 0x1fb   : > { %v1107_v28 = vpop.permute.xlu1 %1106 }
 0x1fc   : > { %v1169_v43 = vpop.permute.xlu0 %1168  ;;  %v1535_v20 = vsel %vm1509_vm9, %v1502_v13, %v1107_v28 }
 0x1fd   : > { %2249 = vrot.lane.b32.xlu1 %v2248_v23, %s2277_s23 }
 0x1fe   : > { %1086 = vrot.lane.b32.xlu0 %v4406_v26, %s2277_s23  ;;  %v1518_v26 = vsel %vm1509_vm9, %v1485_v55, %v1073_v49 }
 0x1ff   : > { %v1201_v0 = vpop.permute.xlu1 %1200  ;;  %v1551_v2 = vsel %vm1542_vm10, %v1518_v26, %v1169_v43 }
 0x200   : > { %v885_v27 = vpop.permute.xlu0 %884  ;;  %v1567_v53 = vsel %vm1542_vm10, %v1534_v19, %v1201_v0 }
 0x201   : > { %1180 = vrot.lane.b32.xlu1 %v4427_v47, %s2278_s28  ;;  %v1454_v10 = vsel %vm1443_vm7, %v3249_v56, %v885_v27 }
 0x202   : > { %2254 = vrot.lane.b32.xlu0 %v4428_v18, %s2278_s28  ;;  %v4434_v18 = vld [vmem:[#allocation28_spill] sm:$0xff] }
 0x203   : > { %v917_v14 = vpop.permute.xlu1 %916 }
 0x204   : > { %v1171_v61 = vpop.permute.xlu0 %1170  ;;  %v1470_v49 = vsel %vm1443_vm7, %v4433_v21, %v917_v14 }
 0x205   : > { %1182 = vrot.lane.b32.xlu1 %v4429_v59, %s2278_s28  ;;  %v1552_v4 = vsel %vm1542_vm10, %v1519_v54, %v1171_v61 }
 0x206   : > { %1276 = vrot.lane.b32.xlu0 %v4430_v8, %s2279_s8  ;;  %v4435_v8 = vld [vmem:[#allocation72_spill] sm:$0xff] }
 0x207   : > { %v1203_v9 = vpop.permute.xlu1 %1202 }
 0x208   : > { %v1265_v15 = vpop.permute.xlu0 %1264  ;;  %v1568_v44 = vsel %vm1542_vm10, %v1535_v20, %v1203_v9 }
 0x209   : > { %v1584_v39 = vsel %vm1575_vm11, %v1551_v2, %v1265_v15  ;;  %2259 = vrot.lane.b32.xlu1 %v4431_v22, %s2279_s8 }
 0x20a   : > { %2171 = vmatprep.mubr.msk.f32.mxu0 %vm1620_vm12, %v1584_v39  ;;  %1278 = vrot.lane.b32.xlu0 %v4432_v7, %s2279_s8 }
 0x20b   : > { %v1297_v35 = vpop.permute.xlu1 %1296 }
 0x20c   : > { %v887_v51 = vpop.permute.xlu0 %886  ;;  %v1600_v52 = vsel %vm1575_vm11, %v1567_v53, %v1297_v35 }
 0x20d   : > { %2195 = vmatprep.mubr.msk.f32.mxu1 %vm1620_vm12, %v1600_v52  ;;  %v1455_v14 = vsel %vm1443_vm7, %v4434_v18, %v887_v51  ;;  %v4439_v18 = vld [vmem:[#allocation90_spill] sm:$0xff] }
 0x20f   : > { %v919_v34 = vpop.permute.xlu1 %918 }
 0x210   : > { %v981_v58 = vpop.permute.xlu0 %980  ;;  %v1471_v2 = vsel %vm1443_vm7, %v4435_v8, %v919_v34 }
 0x211   : > { %v1487_v6 = vsel %vm1476_vm8, %v1454_v10, %v981_v58  ;;  %v3933_v58 = vld [vmem:[%s4103_s2] ss:$0 sm:$0xff] }
 0x213   : > { %v1013_v57 = vpop.permute.xlu1 %1012 }
 0x214   : > { %v1267_v40 = vpop.permute.xlu0 %1266  ;;  %v1503_v42 = vsel %vm1476_vm8, %v1470_v49, %v1013_v57 }
 0x215   : > { %v1585_v37 = vsel %vm1575_vm11, %v1552_v4, %v1267_v40 }
 0x216   : > { %2172 = vmatmul.mubr.msk.f32.gmra.mrb[8].mxu0 %vm1620_vm12, %v1585_v37 }
 0x217   : > { %v1299_v62 = vpop.permute.xlu1 %1298 }
 0x218   : > { %v983_v60 = vpop.permute.xlu0 %982  ;;  %v1601_v31 = vsel %vm1575_vm11, %v1568_v44, %v1299_v62 }
 0x219   : > { %2196 = vmatmul.mubr.msk.f32.gmra.mrb[8].mxu1 %vm1620_vm12, %v1601_v31  ;;  %v1488_v61 = vsel %vm1476_vm8, %v1455_v14, %v983_v60 }
 0x21b   : > { %v1015_v12 = vpop.permute.xlu1 %1014 }
 0x21c   : > { %v1077_v41 = vpop.permute.xlu0 %1076  ;;  %v1504_v15 = vsel %vm1476_vm8, %v1471_v2, %v1015_v12 }
 0x21d   : > { %v1520_v45 = vsel %vm1509_vm9, %v1487_v6, %v1077_v41  ;;  %v4436_v41 = vld [vmem:[#allocation95_spill] sm:$0xff] }
 0x21f   : > { %v1109_v11 = vpop.permute.xlu1 %1108 }
 0x220   : > { %v1079_v3 = vpop.permute.xlu0 %1078  ;;  %v1536_v23 = vsel %vm1509_vm9, %v1503_v42, %v1109_v11 }
 0x221   : > { %v1521_v48 = vsel %vm1509_vm9, %v1488_v61, %v1079_v3 }
 0x223   : > { %v1111_v25 = vpop.permute.xlu1 %1110 }
 0x224   : > { %v1173_v17 = vpop.permute.xlu0 %1172  ;;  %v1537_v36 = vsel %vm1509_vm9, %v1504_v15, %v1111_v25 }
 0x225   : > { %v1553_v29 = vsel %vm1542_vm10, %v1520_v45, %v1173_v17 }
 0x227   : > { %v1205_v50 = vpop.permute.xlu1 %1204 }
 0x228   : > { %v3894_v32 = vpop.permute.xlu0 %888  ;;  %v1569_v56 = vsel %vm1542_vm10, %v1536_v23, %v1205_v50  ;;  %v4438_v23 = vld [vmem:[#allocation29_spill] sm:$0xff] }
 0x229   : > { %v1456_v11 = vsel %vm1443_vm7, %v4436_v41, %v3894_v32 }
 0x22b   : > { %v3896_v5 = vpop.permute.xlu1 %920 }
 0x22c   : > { %v1175_v30 = vpop.permute.xlu0 %1174 }
 0x22d   : > { %v1554_v55 = vsel %vm1542_vm10, %v1521_v48, %v1175_v30  ;;  %v4437_v30 = vld [vmem:[#allocation27_spill] sm:$0xff] }
 0x22e   : > { %v1472_v10 = vsel %vm1443_vm7, %v4437_v30, %v3896_v5  ;;  %v4443_v30 = vld [vmem:[#allocation73_spill] sm:$0xff] }
 0x22f   : > { %v1207_v16 = vpop.permute.xlu1 %1206 }
 0x230   : > { %v1269_v1 = vpop.permute.xlu0 %1268  ;;  %v1570_v39 = vsel %vm1542_vm10, %v1537_v36, %v1207_v16 }
 0x231   : > { %v1586_v24 = vsel %vm1575_vm11, %v1553_v29, %v1269_v1 }
 0x232   : > { %2174 = vmatprep.mubr.msk.f32.mxu0 %vm1620_vm12, %v1586_v24 }
 0x233   : > { %v1301_v28 = vpop.permute.xlu1 %1300 }
 0x234   : > { %v3910_v43 = vpop.permute.xlu0 %890  ;;  %v1602_v0 = vsel %vm1575_vm11, %v1569_v56, %v1301_v28 }
 0x235   : > { %2198 = vmatprep.mubr.msk.f32.mxu1 %vm1620_vm12, %v1602_v0  ;;  %v1457_v56 = vsel %vm1443_vm7, %v4438_v23, %v3910_v43 }
 0x237   : > { %v3914_v27 = vpop.permute.xlu1 %922 }
 0x238   : > { %v985_v47 = vpop.permute.xlu0 %984  ;;  %v1473_v14 = vsel %vm1443_vm7, %v4439_v18, %v3914_v27 }
 0x239   : > { %v1489_v25 = vsel %vm1476_vm8, %v1456_v11, %v985_v47 }
 0x23b   : > { %v1017_v59 = vpop.permute.xlu1 %1016 }
 0x23c   : > { %v1271_v26 = vpop.permute.xlu0 %1270  ;;  %v1505_v29 = vsel %vm1476_vm8, %v1472_v10, %v1017_v59 }
 0x23d   : > { %v1587_v9 = vsel %vm1575_vm11, %v1554_v55, %v1271_v26 }
 0x23e   : > { %2175 = vmatmul.mubr.msk.f32.gmra.mrb[10].mxu0 %vm1620_vm12, %v1587_v9 }
 0x23f   : > { %v1303_v33 = vpop.permute.xlu1 %1302 }
 0x240   : > { %v987_v22 = vpop.permute.xlu0 %986  ;;  %v1603_v19 = vsel %vm1575_vm11, %v1570_v39, %v1303_v33 }
 0x241   : > { %2199 = vmatmul.mubr.msk.f32.gmra.mrb[10].mxu1 %vm1620_vm12, %v1603_v19  ;;  %v1490_v28 = vsel %vm1476_vm8, %v1457_v56, %v987_v22 }
 0x243   : > { %v1019_v7 = vpop.permute.xlu1 %1018 }
 0x244   : > { %v1081_v53 = vpop.permute.xlu0 %1080  ;;  %v1506_v55 = vsel %vm1476_vm8, %v1473_v14, %v1019_v7 }
 0x245   : > { %v1522_v17 = vsel %vm1509_vm9, %v1489_v25, %v1081_v53 }
 0x247   : > { %v1113_v35 = vpop.permute.xlu1 %1112 }
 0x248   : > { %v1083_v51 = vpop.permute.xlu0 %1082  ;;  %v1538_v16 = vsel %vm1509_vm9, %v1505_v29, %v1113_v35 }
 0x249   : > { %v1523_v0 = vsel %vm1509_vm9, %v1490_v28, %v1083_v51 }
 0x24b   : > { %v1115_v52 = vpop.permute.xlu1 %1114 }
 0x24c   : > { %v1177_v34 = vpop.permute.xlu0 %1176  ;;  %v1539_v26 = vsel %vm1509_vm9, %v1506_v55, %v1115_v52  ;;  %v4440_v52 = vld [vmem:[#allocation96_spill] sm:$0xff] }
 0x24d   : > { %v2161_v63 = vpop.f32.mrb[0].mxu0  ;;  %v1555_v6 = vsel %vm1542_vm10, %v1522_v17, %v1177_v34 }
 0x24e   : > { %v1793_v46 = vadd.f32 %v2161_v63, %v3933_v58  ;;  %v1787_v54 = vpop.f32.mrb[1].mxu0 }
 0x24f   : > { %v1788_v4 = vadd.f32 %v3933_v58, %v1787_v54  ;;  %v1209_v57 = vpop.permute.xlu1 %1208 }
 0x250   : > { %v893_v40 = vpop.permute.xlu0 %892  ;;  %v1947_v38 = vmax.f32 %v1793_v46, 0.0  ;;  %v2185_v13 = vpop.f32.mrb[0].mxu1  ;;  %v1571_v1 = vsel %vm1542_vm10, %v1538_v16, %v1209_v57 }
 0x251   : > { %v1946_v37 = vmax.f32 %v1788_v4, 0.0  ;;  %v1873_v20 = vadd.f32 %v2185_v13, %v3933_v58  ;;  %v1867_v44 = vpop.f32.mrb[1].mxu1  ;;  %v1458_v34 = vsel %vm1443_vm7, %v4440_v52, %v893_v40 }
 0x252   : > { %1979 = vst.msk [vmem:[%s3941_s16 + $0x8] sm:$0xff] %vm1377_vm5, %v1947_v38  ;;  %v1868_v62 = vadd.f32 %v3933_v58, %v1867_v44  ;;  %v4441_v38 = vld [vmem:[#allocation91_spill] sm:$0xff] }
 0x253   : > { %1978 = vst.msk [vmem:[%s3941_s16] sm:$0xff] %vm1377_vm5, %v1946_v37  ;;  %v925_v60 = vpop.permute.xlu1 %924  ;;  %v1963_v12 = vmax.f32 %v1873_v20, 0.0 }
 0x254   : > { %v1179_v31 = vpop.permute.xlu0 %1178  ;;  %v1962_v3 = vmax.f32 %v1868_v62, 0.0  ;;  %v1474_v37 = vsel %vm1443_vm7, %v4441_v38, %v925_v60  ;;  %v4442_v62 = vld [vmem:[#allocation97_spill] sm:$0xff] }
 0x255   : > { %1995 = vst.msk [vmem:[%s3941_s16 + $0x88] sm:$0xff] %vm1377_vm5, %v1963_v12  ;;  %v1556_v61 = vsel %vm1542_vm10, %v1523_v0, %v1179_v31 }
 0x256   : > { %1994 = vst.msk [vmem:[%s3941_s16 + $0x80] sm:$0xff] %vm1377_vm5, %v1962_v3 }
 0x257   : > { %v1211_v50 = vpop.permute.xlu1 %1210 }
 0x258   : > { %v1273_v45 = vpop.permute.xlu0 %1272  ;;  %v1572_v43 = vsel %vm1542_vm10, %v1539_v26, %v1211_v50 }
 0x259   : > { %v1588_v32 = vsel %vm1575_vm11, %v1555_v6, %v1273_v45 }
 0x25a   : > { %2177 = vmatprep.mubr.msk.f32.mxu0 %vm1620_vm12, %v1588_v32 }
 0x25b   : > { %v1305_v21 = vpop.permute.xlu1 %1304 }
 0x25c   : > { %v1604_v49 = vsel %vm1575_vm11, %v1571_v1, %v1305_v21  ;;  %v895_v24 = vpop.permute.xlu0 %894 }
 0x25d   : > { %2201 = vmatprep.mubr.msk.f32.mxu1 %vm1620_vm12, %v1604_v49  ;;  %v1459_v31 = vsel %vm1443_vm7, %v4442_v62, %v895_v24 }
 0x25f   : > { %v927_v5 = vpop.permute.xlu1 %926 }
 0x260   : > { %v989_v42 = vpop.permute.xlu0 %988  ;;  %v1475_v10 = vsel %vm1443_vm7, %v4443_v30, %v927_v5 }
 0x261   : > { %v1491_v54 = vsel %vm1476_vm8, %v1458_v34, %v989_v42 }
 0x263   : > { %v1021_v47 = vpop.permute.xlu1 %1020 }
 0x264   : > { %v1275_v48 = vpop.permute.xlu0 %1274  ;;  %v1507_v6 = vsel %vm1476_vm8, %v1474_v37, %v1021_v47 }
 0x265   : > { %v1589_v59 = vsel %vm1575_vm11, %v1556_v61, %v1275_v48 }
 0x266   : > { %2178 = vmatmul.mubr.msk.f32.gmra.mrb[12].mxu0 %vm1620_vm12, %v1589_v59 }
 0x267   : > { %v1307_v8 = vpop.permute.xlu1 %1306 }
 0x268   : > { %v1605_v2 = vsel %vm1575_vm11, %v1572_v43, %v1307_v8  ;;  %v991_v9 = vpop.permute.xlu0 %990 }
 0x269   : > { %2202 = vmatmul.mubr.msk.f32.gmra.mrb[12].mxu1 %vm1620_vm12, %v1605_v2  ;;  %v1492_v45 = vsel %vm1476_vm8, %v1459_v31, %v991_v9 }
 0x26b   : > { %v1023_v27 = vpop.permute.xlu1 %1022 }
 0x26c   : > { %v1085_v15 = vpop.permute.xlu0 %1084  ;;  %v1508_v29 = vsel %vm1476_vm8, %v1475_v10, %v1023_v27 }
 0x26d   : > { %v1524_v13 = vsel %vm1509_vm9, %v1491_v54, %v1085_v15 }
 0x26f   : > { %v2250_v36 = vpop.permute.xlu1 %2249 }
 0x270   : > { %v1087_v39 = vpop.permute.xlu0 %1086  ;;  %v2251_v20 = vunpack.i.l.bf16 %v2250_v36  ;;  %v2252_v12 = vunpack.i.h.bf16 %v2250_v36 }
 0x271   : > { %v2164_v33 = vpop.f32.mrb[2].mxu0  ;;  %v1525_v16 = vsel %vm1509_vm9, %v1492_v45, %v1087_v39 }
 0x272   : > { %v1803_v22 = vadd.f32 %v2164_v33, %v3933_v58  ;;  %v1797_v19 = vpop.f32.mrb[3].mxu0  ;;  %v1540_v32 = vsel %vm1509_vm9, %v1507_v6, %v2251_v20  ;;  %v1541_v21 = vsel %vm1509_vm9, %v1508_v29, %v2252_v12 }
 0x273   : > { %v1798_v7 = vadd.f32 %v3933_v58, %v1797_v19  ;;  %v1181_v53 = vpop.permute.xlu1 %1180 }
 0x274   : > { %v1949_v35 = vmax.f32 %v1803_v22, 0.0  ;;  %v2255_v51 = vpop.permute.xlu0 %2254  ;;  %v2188_v46 = vpop.f32.mrb[2].mxu1  ;;  %v1557_v41 = vsel %vm1542_vm10, %v1524_v13, %v1181_v53 }
 0x275   : > { %v1948_v63 = vmax.f32 %v1798_v7, 0.0  ;;  %v1883_v4 = vadd.f32 %v2188_v46, %v3933_v58  ;;  %v1877_v57 = vpop.f32.mrb[3].mxu1  ;;  %v2257_v25 = vunpack.i.h.bf16 %v2255_v51  ;;  %v2256_v60 = vunpack.i.l.bf16 %v2255_v51 }
 0x276   : > { %1981 = vst.msk [vmem:[%s3941_s16 + $0x18] sm:$0xff] %vm1377_vm5, %v1949_v35  ;;  %v1878_v40 = vadd.f32 %v3933_v58, %v1877_v57 }
 0x277   : > { %1980 = vst.msk [vmem:[%s3941_s16 + $0x10] sm:$0xff] %vm1377_vm5, %v1948_v63  ;;  %v1183_v44 = vpop.permute.xlu1 %1182  ;;  %v1965_v11 = vmax.f32 %v1883_v4, 0.0  ;;  %v1573_v56 = vsel %vm1542_vm10, %v1540_v32, %v2256_v60  ;;  %v1574_v28 = vsel %vm1542_vm10, %v1541_v21, %v2257_v25 }
 0x278   : > { %v1277_v3 = vpop.permute.xlu0 %1276  ;;  %v1964_v17 = vmax.f32 %v1878_v40, 0.0  ;;  %v1558_v49 = vsel %vm1542_vm10, %v1525_v16, %v1183_v44 }
 0x279   : > { %v1590_v50 = vsel %vm1575_vm11, %v1557_v41, %v1277_v3  ;;  %1997 = vst.msk [vmem:[%s3941_s16 + $0x98] sm:$0xff] %vm1377_vm5, %v1965_v11 }
 0x27a   : > { %2180 = vmatprep.mubr.msk.f32.mxu0 %vm1620_vm12, %v1590_v50  ;;  %1996 = vst.msk [vmem:[%s3941_s16 + $0x90] sm:$0xff] %vm1377_vm5, %v1964_v17 }
 0x27b   : > { %v2260_v1 = vpop.permute.xlu1 %2259 }
 0x27c   : > { %v2262_v24 = vunpack.i.h.bf16 %v2260_v1  ;;  %v2261_v5 = vunpack.i.l.bf16 %v2260_v1  ;;  %v1279_v42 = vpop.permute.xlu0 %1278 }
 0x27d   : > { %v1591_v23 = vsel %vm1575_vm11, %v1558_v49, %v1279_v42 }
 0x27e   : > { %2181 = vmatmul.mubr.msk.f32.gmra.mrb[14].mxu0 %vm1620_vm12, %v1591_v23  ;;  %v1606_v0 = vsel %vm1575_vm11, %v1573_v56, %v2261_v5  ;;  %v1607_v47 = vsel %vm1575_vm11, %v1574_v28, %v2262_v24 }
 0x27f   : > { %2204 = vmatprep.mubr.msk.f32.mxu1 %vm1620_vm12, %v1606_v0 }
 0x280   : > { %2205 = vmatmul.mubr.msk.f32.gmra.mrb[14].mxu1 %vm1620_vm12, %v1607_v47 }
 0x299   : > { %v2167_v18 = vpop.f32.mrb[4].mxu0 }
 0x29a   : > { %v1813_v14 = vadd.f32 %v2167_v18, %v3933_v58  ;;  %v1807_v61 = vpop.f32.mrb[5].mxu0 }
 0x29b   : > { %v1808_v48 = vadd.f32 %v3933_v58, %v1807_v61 }
 0x29c   : > { %v1951_v55 = vmax.f32 %v1813_v14, 0.0  ;;  %v2191_v26 = vpop.f32.mrb[4].mxu1 }
 0x29d   : > { %v1950_v59 = vmax.f32 %v1808_v48, 0.0  ;;  %v1893_v43 = vadd.f32 %v2191_v26, %v3933_v58  ;;  %v1887_v8 = vpop.f32.mrb[5].mxu1 }
 0x29e   : > { %1983 = vst.msk [vmem:[%s3941_s16 + $0x28] sm:$0xff] %vm1377_vm5, %v1951_v55  ;;  %v1888_v2 = vadd.f32 %v3933_v58, %v1887_v8 }
 0x29f   : > { %1982 = vst.msk [vmem:[%s3941_s16 + $0x20] sm:$0xff] %vm1377_vm5, %v1950_v59  ;;  %v1967_v9 = vmax.f32 %v1893_v43, 0.0 }
 0x2a0   : > { %v1966_v27 = vmax.f32 %v1888_v2, 0.0 }
 0x2a1   : > { %1999 = vst.msk [vmem:[%s3941_s16 + $0xa8] sm:$0xff] %vm1377_vm5, %v1967_v9 }
 0x2a2   : > { %1998 = vst.msk [vmem:[%s3941_s16 + $0xa0] sm:$0xff] %vm1377_vm5, %v1966_v27 }
 0x2c1   : > { %v2170_v15 = vpop.f32.mrb[6].mxu0 }
 0x2c2   : > { %v1823_v36 = vadd.f32 %v2170_v15, %v3933_v58  ;;  %v1817_v39 = vpop.f32.mrb[7].mxu0 }
 0x2c3   : > { %v1818_v33 = vadd.f32 %v3933_v58, %v1817_v39 }
 0x2c4   : > { %v1953_v22 = vmax.f32 %v1823_v36, 0.0  ;;  %v2194_v7 = vpop.f32.mrb[6].mxu1 }
 0x2c5   : > { %v1952_v19 = vmax.f32 %v1818_v33, 0.0  ;;  %v1903_v53 = vadd.f32 %v2194_v7, %v3933_v58  ;;  %v1897_v35 = vpop.f32.mrb[7].mxu1 }
 0x2c6   : > { %1985 = vst.msk [vmem:[%s3941_s16 + $0x38] sm:$0xff] %vm1377_vm5, %v1953_v22  ;;  %v1898_v51 = vadd.f32 %v3933_v58, %v1897_v35 }
 0x2c7   : > { %1984 = vst.msk [vmem:[%s3941_s16 + $0x30] sm:$0xff] %vm1377_vm5, %v1952_v19  ;;  %v1969_v52 = vmax.f32 %v1903_v53, 0.0 }
 0x2c8   : > { %v1968_v34 = vmax.f32 %v1898_v51, 0.0 }
 0x2c9   : > { %2001 = vst.msk [vmem:[%s3941_s16 + $0xb8] sm:$0xff] %vm1377_vm5, %v1969_v52 }
 0x2ca   : > { %2000 = vst.msk [vmem:[%s3941_s16 + $0xb0] sm:$0xff] %vm1377_vm5, %v1968_v34 }
 0x2e9   : > { %v2173_v63 = vpop.f32.mrb[8].mxu0 }
 0x2ea   : > { %v1833_v46 = vadd.f32 %v2173_v63, %v3933_v58  ;;  %v1827_v54 = vpop.f32.mrb[9].mxu0 }
 0x2eb   : > { %v1828_v4 = vadd.f32 %v3933_v58, %v1827_v54 }
 0x2ec   : > { %v1955_v57 = vmax.f32 %v1833_v46, 0.0  ;;  %v2197_v37 = vpop.f32.mrb[8].mxu1 }
 0x2ed   : > { %v1954_v38 = vmax.f32 %v1828_v4, 0.0  ;;  %v1913_v13 = vadd.f32 %v2197_v37, %v3933_v58  ;;  %v1907_v20 = vpop.f32.mrb[9].mxu1 }
 0x2ee   : > { %1987 = vst.msk [vmem:[%s3941_s16 + $0x48] sm:$0xff] %vm1377_vm5, %v1955_v57  ;;  %v1908_v40 = vadd.f32 %v3933_v58, %v1907_v20 }
 0x2ef   : > { %1986 = vst.msk [vmem:[%s3941_s16 + $0x40] sm:$0xff] %vm1377_vm5, %v1954_v38  ;;  %v1971_v44 = vmax.f32 %v1913_v13, 0.0 }
 0x2f0   : > { %v1970_v62 = vmax.f32 %v1908_v40, 0.0 }
 0x2f1   : > { %2003 = vst.msk [vmem:[%s3941_s16 + $0xc8] sm:$0xff] %vm1377_vm5, %v1971_v44 }
 0x2f2   : > { %2002 = vst.msk [vmem:[%s3941_s16 + $0xc0] sm:$0xff] %vm1377_vm5, %v1970_v62 }
 0x311   : > { %v2176_v31 = vpop.f32.mrb[10].mxu0 }
 0x312   : > { %v1843_v12 = vadd.f32 %v2176_v31, %v3933_v58  ;;  %v1837_v41 = vpop.f32.mrb[11].mxu0 }
 0x313   : > { %v1838_v11 = vadd.f32 %v3933_v58, %v1837_v41 }
 0x314   : > { %v1957_v3 = vmax.f32 %v1843_v12, 0.0  ;;  %v2200_v60 = vpop.f32.mrb[10].mxu1 }
 0x315   : > { %v1956_v25 = vmax.f32 %v1838_v11, 0.0  ;;  %v1923_v17 = vadd.f32 %v2200_v60, %v3933_v58  ;;  %v1917_v50 = vpop.f32.mrb[11].mxu1 }
 0x316   : > { %1989 = vst.msk [vmem:[%s3941_s16 + $0x58] sm:$0xff] %vm1377_vm5, %v1957_v3  ;;  %v1918_v30 = vadd.f32 %v3933_v58, %v1917_v50 }
 0x317   : > { %1988 = vst.msk [vmem:[%s3941_s16 + $0x50] sm:$0xff] %vm1377_vm5, %v1956_v25  ;;  %v1973_v10 = vmax.f32 %v1923_v17, 0.0 }
 0x318   : > { %v1972_v6 = vmax.f32 %v1918_v30, 0.0 }
 0x319   : > { %2005 = vst.msk [vmem:[%s3941_s16 + $0xd8] sm:$0xff] %vm1377_vm5, %v1973_v10 }
 0x31a   : > { %2004 = vst.msk [vmem:[%s3941_s16 + $0xd0] sm:$0xff] %vm1377_vm5, %v1972_v6 }
 0x339   : > { %v2179_v45 = vpop.f32.mrb[12].mxu0 }
 0x33a   : > { %v1853_v29 = vadd.f32 %v2179_v45, %v3933_v58  ;;  %v1847_v32 = vpop.f32.mrb[13].mxu0 }
 0x33b   : > { %v1848_v16 = vadd.f32 %v3933_v58, %v1847_v32 }
 0x33c   : > { %v1959_v1 = vmax.f32 %v1853_v29, 0.0  ;;  %v2203_v21 = vpop.f32.mrb[12].mxu1 }
 0x33d   : > { %v1958_v49 = vmax.f32 %v1848_v16, 0.0  ;;  %v1933_v24 = vadd.f32 %v2203_v21, %v3933_v58  ;;  %v1927_v5 = vpop.f32.mrb[13].mxu1 }
 0x33e   : > { %1991 = vst.msk [vmem:[%s3941_s16 + $0x68] sm:$0xff] %vm1377_vm5, %v1959_v1  ;;  %v1928_v42 = vadd.f32 %v3933_v58, %v1927_v5 }
 0x33f   : > { %1990 = vst.msk [vmem:[%s3941_s16 + $0x60] sm:$0xff] %vm1377_vm5, %v1958_v49  ;;  %v1975_v23 = vmax.f32 %v1933_v24, 0.0 }
 0x340   : > { %v1974_v56 = vmax.f32 %v1928_v42, 0.0 }
 0x341   : > { %2007 = vst.msk [vmem:[%s3941_s16 + $0xe8] sm:$0xff] %vm1377_vm5, %v1975_v23 }
 0x342   : > { %2006 = vst.msk [vmem:[%s3941_s16 + $0xe0] sm:$0xff] %vm1377_vm5, %v1974_v56 }
 0x351   : > { %v2182_v28 = vpop.f32.mrb[14].mxu0 }
 0x352   : > { %v1863_v0 = vadd.f32 %v2182_v28, %v3933_v58  ;;  %v1857_v47 = vpop.f32.mrb[15].mxu0 }
 0x353   : > { %v1858_v18 = vadd.f32 %v3933_v58, %v1857_v47  ;;  %v2206_v14 = vpop.f32.mrb[14].mxu1 }
 0x354   : > { %v1961_v61 = vmax.f32 %v1863_v0, 0.0  ;;  %v1943_v48 = vadd.f32 %v2206_v14, %v3933_v58  ;;  %v1937_v55 = vpop.f32.mrb[15].mxu1 }
 0x355   : > { %v1960_v59 = vmax.f32 %v1858_v18, 0.0  ;;  %v1938_v26 = vadd.f32 %v3933_v58, %v1937_v55 }
 0x356   : > { %1993 = vst.msk [vmem:[%s3941_s16 + $0x78] sm:$0xff] %vm1377_vm5, %v1961_v61  ;;  %v1977_v43 = vmax.f32 %v1943_v48, 0.0 }
 0x357   : > { %1992 = vst.msk [vmem:[%s3941_s16 + $0x70] sm:$0xff] %vm1377_vm5, %v1960_v59  ;;  %v1976_v8 = vmax.f32 %v1938_v26, 0.0 }
 0x358   : > { %2009 = vst.msk [vmem:[%s3941_s16 + $0xf8] sm:$0xff] %vm1377_vm5, %v1977_v43 }
 0x359   : > { %2008 = vst.msk [vmem:[%s3941_s16 + $0xf0] sm:$0xff] %vm1377_vm5, %v1976_v8 }
 0x35a PF: > { %s13_s12 = sadd.s32 1, %s2269_s12  }
 0x35b   : > { %p10_p4 = scmp.ge.s32.totalorder %s13_s12, 4  }
 0x35d   :  { %12 = sbr.rel (!%p10_p4) target bundleno = 1 (0x1), region = 62 }

</bundles_post_ra>
